<compile_context>
chip_gen: v7x
topology: tpu7x:2x2x1
jax: 0.10.0
libtpu: 0.0.40
codegen_flags: <defaults>
</compile_context>

<pallas_src>
import jax
import jax.numpy as jnp
from jax.experimental import pallas as pl
from jax.experimental.pallas import tpu as pltpu


def _make_linear_kernel(num_fields, slots):
    """Build the first-order kernel with static per-field vocab slots baked in.

    slots[f] = (lo, hi): field f's indices are only compared against vocab
    rows [lo, hi).  With field_features=None every slot is (0, V).
    """

    def kernel(idx_ref, table_ref, out_ref):
        # idx_ref:   (F, SUB, LANES) int32  -- batch tile on (sublane, lane)
        # table_ref: (V,) float32 in SMEM   -- whole table, scalar reads
        # out_ref:   (SUB, LANES) float32   -- dense output tile
        acc = jnp.zeros(out_ref.shape, jnp.float32)
        for f in range(num_fields):
            idx_f = idx_ref[f]                      # (SUB, LANES) int32, 2 vregs
            lo, hi = slots[f]
            for r in range(lo, hi):                 # static vocab row id
                t_r = table_ref[r]                  # scalar SMEM read
                acc = acc + jnp.where(idx_f == r, t_r, 0.0)
        out_ref[...] = acc

    return kernel


def linear_layer_forward(x_idx, table, field_features=None, *,
                         tile_lanes=256, sub_rows=8):
    """First-order FM term:  out[n] = sum_f table[x_idx[n, f]],  shape [N, 1].

    x_idx:          [N, F] integer indices into the shared embedding table.
    table:          [V, 1] (or [V]) float32 embedding weights.
    field_features: optional static tuple; if given, field f's indices are
                    assumed to lie in its own contiguous vocab slot (the usual
                    FM construction with offsets), enabling ~F x less compare
                    work.  Pass None for arbitrary indices per field.
    """
    assert sub_rows % 8 == 0 and tile_lanes % 128 == 0, \
        "batch tile must be a multiple of the (8, 128) vreg tile"
    n, num_fields = x_idx.shape
    table_flat = jnp.asarray(table, jnp.float32).reshape(-1)
    vocab = table_flat.shape[0]

    if field_features is not None:
        assert len(field_features) == num_fields
        assert sum(int(s) for s in field_features) == vocab
        offs = [0]
        for s in field_features:
            offs.append(offs[-1] + int(s))
        slots = [(offs[f], offs[f + 1]) for f in range(num_fields)]
    else:
        slots = [(0, vocab)] * num_fields

    tile_n = sub_rows * tile_lanes                  # batch elems per grid step
    n_pad = pl.cdiv(n, tile_n) * tile_n
    num_tiles = n_pad // tile_n

    # Pad batch with -1: padded slots never match any vocab row -> contribute 0.
    # TODO(synk): producing indices as [F, N] upstream would avoid this extra
    # HBM pass (pad + transpose) over the index tensor for very large N.
    idx = jnp.pad(x_idx.astype(jnp.int32), ((0, n_pad - n), (0, 0)),
                  constant_values=-1)
    # [N_pad, F] -> [F, num_tiles*SUB, LANES]; batch element b maps to
    # (tile, sub, lane) = (b // tile_n, (b % tile_n) // LANES, b % LANES),
    # matching the output layout below.
    idx = idx.T.reshape(num_fields, num_tiles * sub_rows, tile_lanes)

    kernel = _make_linear_kernel(num_fields, slots)

    out = pl.pallas_call(
        kernel,
        out_shape=jax.ShapeDtypeStruct((num_tiles * sub_rows, tile_lanes),
                                       jnp.float32),
        grid=(num_tiles,),
        in_specs=[
            # Per-step batch tile of indices for all fields.
            pl.BlockSpec((num_fields, sub_rows, tile_lanes),
                         lambda i: (0, i, 0)),
            # Whole embedding table, resident in SMEM (scalar reads only).
            pl.BlockSpec(memory_space=pltpu.MemorySpace.SMEM),
        ],
        # Fully dense (8, LANES) output tile -> unmasked vector stores.
        out_specs=pl.BlockSpec((sub_rows, tile_lanes), lambda i: (i, 0)),
        compiler_params=pltpu.CompilerParams(
            dimension_semantics=("parallel",),
        ),
    )(idx, table_flat)

    # Layout plumbing back to the PyTorch [N, 1] shape.
    return out.reshape(n_pad, 1)[:n]


if __name__ == "__main__":
    key = jax.random.PRNGKey(0)

    # Small FM setup: 4 fields with 16 categories each -> vocab = 64
    field_features = (16, 16, 16, 16)
    vocab = sum(field_features)          # V = 64
    batch = 8                            # N
    num_fields = len(field_features)     # F

    k_table, k_idx = jax.random.split(key)

    # Deterministic "nn.Embedding(sum(field_features), 1)" weights
    table = jax.random.normal(k_table, (vocab, 1), dtype=jnp.float32)

    # Indices: each field f picks an index inside its own slot of the table
    offsets = jnp.cumsum(jnp.array((0,) + field_features[:-1], dtype=jnp.int32))
    local_idx = jax.random.randint(
        k_idx, (batch, num_fields), 0, field_features[0], dtype=jnp.int32
    )
    x_idx = local_idx + offsets[None, :]                 # [N, F] global indices

    # Reference (plain JAX embedding lookup + sum over fields)
    ref = jnp.take(table[:, 0], x_idx, axis=0).sum(axis=1, keepdims=True)

    # Fast path: static per-field vocab slots.
    out = linear_layer_forward(x_idx, table, field_features)
    jax.block_until_ready(out)
    assert out.shape == (batch, 1)
    assert jnp.allclose(out, ref, atol=1e-5), (out, ref)

    # General path: arbitrary indices per field (matches nn.Embedding usage).
    out_general = linear_layer_forward(x_idx, table, None)
    jax.block_until_ready(out_general)
    assert jnp.allclose(out_general, ref, atol=1e-5), (out_general, ref)

    print("KERNEL_OK")
</pallas_src>

<mosaic_0001>
module attributes {stable_mosaic.version = 11 : i64} {
  func.func @kernel(%arg0: i32, %arg1: memref<4x8x256xi32, #tpu.memory_space<vmem>>, %arg2: memref<64xf32, #tpu.memory_space<smem>>, %arg3: memref<8x256xf32, #tpu.memory_space<vmem>>) attributes {dimension_semantics = [#tpu.dimension_semantics<parallel>], iteration_bounds = array<i64: 1>, scalar_prefetch = 0 : i64, scratch_operands = 0 : i64, tpu.core_type = #tpu.core_type<tc>, window_params = [{transform_indices = @transform_0, window_bounds = array<i64: 4, 8, 256>}, {transform_indices = @transform_1, window_bounds = array<i64: 64>}, {transform_indices = @transform_2, window_bounds = array<i64: 8, 256>}]} {
    %cst = arith.constant 0.000000e+00 : f32
    %0 = vector.broadcast %cst : f32 to vector<8x256xf32>
    %c0 = arith.constant 0 : index
    %c0_0 = arith.constant 0 : index
    %c0_1 = arith.constant 0 : index
    %1 = vector.load %arg1[%c0, %c0_0, %c0_1] : memref<4x8x256xi32, #tpu.memory_space<vmem>>, vector<1x8x256xi32>
    %2 = vector.shape_cast %1 : vector<1x8x256xi32> to vector<8x256xi32>
    %c0_2 = arith.constant 0 : index
    %3 = memref.load %arg2[%c0_2] : memref<64xf32, #tpu.memory_space<smem>>
    %c0_i32 = arith.constant 0 : i32
    %4 = vector.broadcast %c0_i32 : i32 to vector<8x256xi32>
    %5 = arith.cmpi eq, %2, %4 : vector<8x256xi32>
    %cst_3 = arith.constant 0.000000e+00 : f32
    %6 = vector.broadcast %3 : f32 to vector<8x256xf32>
    %7 = vector.broadcast %cst_3 : f32 to vector<8x256xf32>
    %8 = arith.select %5, %6, %7 : vector<8x256xi1>, vector<8x256xf32>
    %9 = arith.addf %0, %8 : vector<8x256xf32>
    %c1 = arith.constant 1 : index
    %10 = memref.load %arg2[%c1] : memref<64xf32, #tpu.memory_space<smem>>
    %c1_i32 = arith.constant 1 : i32
    %11 = vector.broadcast %c1_i32 : i32 to vector<8x256xi32>
    %12 = arith.cmpi eq, %2, %11 : vector<8x256xi32>
    %cst_4 = arith.constant 0.000000e+00 : f32
    %13 = vector.broadcast %10 : f32 to vector<8x256xf32>
    %14 = vector.broadcast %cst_4 : f32 to vector<8x256xf32>
    %15 = arith.select %12, %13, %14 : vector<8x256xi1>, vector<8x256xf32>
    %16 = arith.addf %9, %15 : vector<8x256xf32>
    %c2 = arith.constant 2 : index
    %17 = memref.load %arg2[%c2] : memref<64xf32, #tpu.memory_space<smem>>
    %c2_i32 = arith.constant 2 : i32
    %18 = vector.broadcast %c2_i32 : i32 to vector<8x256xi32>
    %19 = arith.cmpi eq, %2, %18 : vector<8x256xi32>
    %cst_5 = arith.constant 0.000000e+00 : f32
    %20 = vector.broadcast %17 : f32 to vector<8x256xf32>
    %21 = vector.broadcast %cst_5 : f32 to vector<8x256xf32>
    %22 = arith.select %19, %20, %21 : vector<8x256xi1>, vector<8x256xf32>
    %23 = arith.addf %16, %22 : vector<8x256xf32>
    %c3 = arith.constant 3 : index
    %24 = memref.load %arg2[%c3] : memref<64xf32, #tpu.memory_space<smem>>
    %c3_i32 = arith.constant 3 : i32
    %25 = vector.broadcast %c3_i32 : i32 to vector<8x256xi32>
    %26 = arith.cmpi eq, %2, %25 : vector<8x256xi32>
    %cst_6 = arith.constant 0.000000e+00 : f32
    %27 = vector.broadcast %24 : f32 to vector<8x256xf32>
    %28 = vector.broadcast %cst_6 : f32 to vector<8x256xf32>
    %29 = arith.select %26, %27, %28 : vector<8x256xi1>, vector<8x256xf32>
    %30 = arith.addf %23, %29 : vector<8x256xf32>
    %c4 = arith.constant 4 : index
    %31 = memref.load %arg2[%c4] : memref<64xf32, #tpu.memory_space<smem>>
    %c4_i32 = arith.constant 4 : i32
    %32 = vector.broadcast %c4_i32 : i32 to vector<8x256xi32>
    %33 = arith.cmpi eq, %2, %32 : vector<8x256xi32>
    %cst_7 = arith.constant 0.000000e+00 : f32
    %34 = vector.broadcast %31 : f32 to vector<8x256xf32>
    %35 = vector.broadcast %cst_7 : f32 to vector<8x256xf32>
    %36 = arith.select %33, %34, %35 : vector<8x256xi1>, vector<8x256xf32>
    %37 = arith.addf %30, %36 : vector<8x256xf32>
    %c5 = arith.constant 5 : index
    %38 = memref.load %arg2[%c5] : memref<64xf32, #tpu.memory_space<smem>>
    %c5_i32 = arith.constant 5 : i32
    %39 = vector.broadcast %c5_i32 : i32 to vector<8x256xi32>
    %40 = arith.cmpi eq, %2, %39 : vector<8x256xi32>
    %cst_8 = arith.constant 0.000000e+00 : f32
    %41 = vector.broadcast %38 : f32 to vector<8x256xf32>
    %42 = vector.broadcast %cst_8 : f32 to vector<8x256xf32>
    %43 = arith.select %40, %41, %42 : vector<8x256xi1>, vector<8x256xf32>
    %44 = arith.addf %37, %43 : vector<8x256xf32>
    %c6 = arith.constant 6 : index
    %45 = memref.load %arg2[%c6] : memref<64xf32, #tpu.memory_space<smem>>
    %c6_i32 = arith.constant 6 : i32
    %46 = vector.broadcast %c6_i32 : i32 to vector<8x256xi32>
    %47 = arith.cmpi eq, %2, %46 : vector<8x256xi32>
    %cst_9 = arith.constant 0.000000e+00 : f32
    %48 = vector.broadcast %45 : f32 to vector<8x256xf32>
    %49 = vector.broadcast %cst_9 : f32 to vector<8x256xf32>
    %50 = arith.select %47, %48, %49 : vector<8x256xi1>, vector<8x256xf32>
    %51 = arith.addf %44, %50 : vector<8x256xf32>
    %c7 = arith.constant 7 : index
    %52 = memref.load %arg2[%c7] : memref<64xf32, #tpu.memory_space<smem>>
    %c7_i32 = arith.constant 7 : i32
    %53 = vector.broadcast %c7_i32 : i32 to vector<8x256xi32>
    %54 = arith.cmpi eq, %2, %53 : vector<8x256xi32>
    %cst_10 = arith.constant 0.000000e+00 : f32
    %55 = vector.broadcast %52 : f32 to vector<8x256xf32>
    %56 = vector.broadcast %cst_10 : f32 to vector<8x256xf32>
    %57 = arith.select %54, %55, %56 : vector<8x256xi1>, vector<8x256xf32>
    %58 = arith.addf %51, %57 : vector<8x256xf32>
    %c8 = arith.constant 8 : index
    %59 = memref.load %arg2[%c8] : memref<64xf32, #tpu.memory_space<smem>>
    %c8_i32 = arith.constant 8 : i32
    %60 = vector.broadcast %c8_i32 : i32 to vector<8x256xi32>
    %61 = arith.cmpi eq, %2, %60 : vector<8x256xi32>
    %cst_11 = arith.constant 0.000000e+00 : f32
    %62 = vector.broadcast %59 : f32 to vector<8x256xf32>
    %63 = vector.broadcast %cst_11 : f32 to vector<8x256xf32>
    %64 = arith.select %61, %62, %63 : vector<8x256xi1>, vector<8x256xf32>
    %65 = arith.addf %58, %64 : vector<8x256xf32>
    %c9 = arith.constant 9 : index
    %66 = memref.load %arg2[%c9] : memref<64xf32, #tpu.memory_space<smem>>
    %c9_i32 = arith.constant 9 : i32
    %67 = vector.broadcast %c9_i32 : i32 to vector<8x256xi32>
    %68 = arith.cmpi eq, %2, %67 : vector<8x256xi32>
    %cst_12 = arith.constant 0.000000e+00 : f32
    %69 = vector.broadcast %66 : f32 to vector<8x256xf32>
    %70 = vector.broadcast %cst_12 : f32 to vector<8x256xf32>
    %71 = arith.select %68, %69, %70 : vector<8x256xi1>, vector<8x256xf32>
    %72 = arith.addf %65, %71 : vector<8x256xf32>
    %c10 = arith.constant 10 : index
    %73 = memref.load %arg2[%c10] : memref<64xf32, #tpu.memory_space<smem>>
    %c10_i32 = arith.constant 10 : i32
    %74 = vector.broadcast %c10_i32 : i32 to vector<8x256xi32>
    %75 = arith.cmpi eq, %2, %74 : vector<8x256xi32>
    %cst_13 = arith.constant 0.000000e+00 : f32
    %76 = vector.broadcast %73 : f32 to vector<8x256xf32>
    %77 = vector.broadcast %cst_13 : f32 to vector<8x256xf32>
    %78 = arith.select %75, %76, %77 : vector<8x256xi1>, vector<8x256xf32>
    %79 = arith.addf %72, %78 : vector<8x256xf32>
    %c11 = arith.constant 11 : index
    %80 = memref.load %arg2[%c11] : memref<64xf32, #tpu.memory_space<smem>>
    %c11_i32 = arith.constant 11 : i32
    %81 = vector.broadcast %c11_i32 : i32 to vector<8x256xi32>
    %82 = arith.cmpi eq, %2, %81 : vector<8x256xi32>
    %cst_14 = arith.constant 0.000000e+00 : f32
    %83 = vector.broadcast %80 : f32 to vector<8x256xf32>
    %84 = vector.broadcast %cst_14 : f32 to vector<8x256xf32>
    %85 = arith.select %82, %83, %84 : vector<8x256xi1>, vector<8x256xf32>
    %86 = arith.addf %79, %85 : vector<8x256xf32>
    %c12 = arith.constant 12 : index
    %87 = memref.load %arg2[%c12] : memref<64xf32, #tpu.memory_space<smem>>
    %c12_i32 = arith.constant 12 : i32
    %88 = vector.broadcast %c12_i32 : i32 to vector<8x256xi32>
    %89 = arith.cmpi eq, %2, %88 : vector<8x256xi32>
    %cst_15 = arith.constant 0.000000e+00 : f32
    %90 = vector.broadcast %87 : f32 to vector<8x256xf32>
    %91 = vector.broadcast %cst_15 : f32 to vector<8x256xf32>
    %92 = arith.select %89, %90, %91 : vector<8x256xi1>, vector<8x256xf32>
    %93 = arith.addf %86, %92 : vector<8x256xf32>
    %c13 = arith.constant 13 : index
    %94 = memref.load %arg2[%c13] : memref<64xf32, #tpu.memory_space<smem>>
    %c13_i32 = arith.constant 13 : i32
    %95 = vector.broadcast %c13_i32 : i32 to vector<8x256xi32>
    %96 = arith.cmpi eq, %2, %95 : vector<8x256xi32>
    %cst_16 = arith.constant 0.000000e+00 : f32
    %97 = vector.broadcast %94 : f32 to vector<8x256xf32>
    %98 = vector.broadcast %cst_16 : f32 to vector<8x256xf32>
    %99 = arith.select %96, %97, %98 : vector<8x256xi1>, vector<8x256xf32>
    %100 = arith.addf %93, %99 : vector<8x256xf32>
    %c14 = arith.constant 14 : index
    %101 = memref.load %arg2[%c14] : memref<64xf32, #tpu.memory_space<smem>>
    %c14_i32 = arith.constant 14 : i32
    %102 = vector.broadcast %c14_i32 : i32 to vector<8x256xi32>
    %103 = arith.cmpi eq, %2, %102 : vector<8x256xi32>
    %cst_17 = arith.constant 0.000000e+00 : f32
    %104 = vector.broadcast %101 : f32 to vector<8x256xf32>
    %105 = vector.broadcast %cst_17 : f32 to vector<8x256xf32>
    %106 = arith.select %103, %104, %105 : vector<8x256xi1>, vector<8x256xf32>
    %107 = arith.addf %100, %106 : vector<8x256xf32>
    %c15 = arith.constant 15 : index
    %108 = memref.load %arg2[%c15] : memref<64xf32, #tpu.memory_space<smem>>
    %c15_i32 = arith.constant 15 : i32
    %109 = vector.broadcast %c15_i32 : i32 to vector<8x256xi32>
    %110 = arith.cmpi eq, %2, %109 : vector<8x256xi32>
    %cst_18 = arith.constant 0.000000e+00 : f32
    %111 = vector.broadcast %108 : f32 to vector<8x256xf32>
    %112 = vector.broadcast %cst_18 : f32 to vector<8x256xf32>
    %113 = arith.select %110, %111, %112 : vector<8x256xi1>, vector<8x256xf32>
    %114 = arith.addf %107, %113 : vector<8x256xf32>
    %c1_19 = arith.constant 1 : index
    %c0_20 = arith.constant 0 : index
    %c0_21 = arith.constant 0 : index
    %115 = vector.load %arg1[%c1_19, %c0_20, %c0_21] : memref<4x8x256xi32, #tpu.memory_space<vmem>>, vector<1x8x256xi32>
    %116 = vector.shape_cast %115 : vector<1x8x256xi32> to vector<8x256xi32>
    %c16 = arith.constant 16 : index
    %117 = memref.load %arg2[%c16] : memref<64xf32, #tpu.memory_space<smem>>
    %c16_i32 = arith.constant 16 : i32
    %118 = vector.broadcast %c16_i32 : i32 to vector<8x256xi32>
    %119 = arith.cmpi eq, %116, %118 : vector<8x256xi32>
    %cst_22 = arith.constant 0.000000e+00 : f32
    %120 = vector.broadcast %117 : f32 to vector<8x256xf32>
    %121 = vector.broadcast %cst_22 : f32 to vector<8x256xf32>
    %122 = arith.select %119, %120, %121 : vector<8x256xi1>, vector<8x256xf32>
    %123 = arith.addf %114, %122 : vector<8x256xf32>
    %c17 = arith.constant 17 : index
    %124 = memref.load %arg2[%c17] : memref<64xf32, #tpu.memory_space<smem>>
    %c17_i32 = arith.constant 17 : i32
    %125 = vector.broadcast %c17_i32 : i32 to vector<8x256xi32>
    %126 = arith.cmpi eq, %116, %125 : vector<8x256xi32>
    %cst_23 = arith.constant 0.000000e+00 : f32
    %127 = vector.broadcast %124 : f32 to vector<8x256xf32>
    %128 = vector.broadcast %cst_23 : f32 to vector<8x256xf32>
    %129 = arith.select %126, %127, %128 : vector<8x256xi1>, vector<8x256xf32>
    %130 = arith.addf %123, %129 : vector<8x256xf32>
    %c18 = arith.constant 18 : index
    %131 = memref.load %arg2[%c18] : memref<64xf32, #tpu.memory_space<smem>>
    %c18_i32 = arith.constant 18 : i32
    %132 = vector.broadcast %c18_i32 : i32 to vector<8x256xi32>
    %133 = arith.cmpi eq, %116, %132 : vector<8x256xi32>
    %cst_24 = arith.constant 0.000000e+00 : f32
    %134 = vector.broadcast %131 : f32 to vector<8x256xf32>
    %135 = vector.broadcast %cst_24 : f32 to vector<8x256xf32>
    %136 = arith.select %133, %134, %135 : vector<8x256xi1>, vector<8x256xf32>
    %137 = arith.addf %130, %136 : vector<8x256xf32>
    %c19 = arith.constant 19 : index
    %138 = memref.load %arg2[%c19] : memref<64xf32, #tpu.memory_space<smem>>
    %c19_i32 = arith.constant 19 : i32
    %139 = vector.broadcast %c19_i32 : i32 to vector<8x256xi32>
    %140 = arith.cmpi eq, %116, %139 : vector<8x256xi32>
    %cst_25 = arith.constant 0.000000e+00 : f32
    %141 = vector.broadcast %138 : f32 to vector<8x256xf32>
    %142 = vector.broadcast %cst_25 : f32 to vector<8x256xf32>
    %143 = arith.select %140, %141, %142 : vector<8x256xi1>, vector<8x256xf32>
    %144 = arith.addf %137, %143 : vector<8x256xf32>
    %c20 = arith.constant 20 : index
    %145 = memref.load %arg2[%c20] : memref<64xf32, #tpu.memory_space<smem>>
    %c20_i32 = arith.constant 20 : i32
    %146 = vector.broadcast %c20_i32 : i32 to vector<8x256xi32>
    %147 = arith.cmpi eq, %116, %146 : vector<8x256xi32>
    %cst_26 = arith.constant 0.000000e+00 : f32
    %148 = vector.broadcast %145 : f32 to vector<8x256xf32>
    %149 = vector.broadcast %cst_26 : f32 to vector<8x256xf32>
    %150 = arith.select %147, %148, %149 : vector<8x256xi1>, vector<8x256xf32>
    %151 = arith.addf %144, %150 : vector<8x256xf32>
    %c21 = arith.constant 21 : index
    %152 = memref.load %arg2[%c21] : memref<64xf32, #tpu.memory_space<smem>>
    %c21_i32 = arith.constant 21 : i32
    %153 = vector.broadcast %c21_i32 : i32 to vector<8x256xi32>
    %154 = arith.cmpi eq, %116, %153 : vector<8x256xi32>
    %cst_27 = arith.constant 0.000000e+00 : f32
    %155 = vector.broadcast %152 : f32 to vector<8x256xf32>
    %156 = vector.broadcast %cst_27 : f32 to vector<8x256xf32>
    %157 = arith.select %154, %155, %156 : vector<8x256xi1>, vector<8x256xf32>
    %158 = arith.addf %151, %157 : vector<8x256xf32>
    %c22 = arith.constant 22 : index
    %159 = memref.load %arg2[%c22] : memref<64xf32, #tpu.memory_space<smem>>
    %c22_i32 = arith.constant 22 : i32
    %160 = vector.broadcast %c22_i32 : i32 to vector<8x256xi32>
    %161 = arith.cmpi eq, %116, %160 : vector<8x256xi32>
    %cst_28 = arith.constant 0.000000e+00 : f32
    %162 = vector.broadcast %159 : f32 to vector<8x256xf32>
    %163 = vector.broadcast %cst_28 : f32 to vector<8x256xf32>
    %164 = arith.select %161, %162, %163 : vector<8x256xi1>, vector<8x256xf32>
    %165 = arith.addf %158, %164 : vector<8x256xf32>
    %c23 = arith.constant 23 : index
    %166 = memref.load %arg2[%c23] : memref<64xf32, #tpu.memory_space<smem>>
    %c23_i32 = arith.constant 23 : i32
    %167 = vector.broadcast %c23_i32 : i32 to vector<8x256xi32>
    %168 = arith.cmpi eq, %116, %167 : vector<8x256xi32>
    %cst_29 = arith.constant 0.000000e+00 : f32
    %169 = vector.broadcast %166 : f32 to vector<8x256xf32>
    %170 = vector.broadcast %cst_29 : f32 to vector<8x256xf32>
    %171 = arith.select %168, %169, %170 : vector<8x256xi1>, vector<8x256xf32>
    %172 = arith.addf %165, %171 : vector<8x256xf32>
    %c24 = arith.constant 24 : index
    %173 = memref.load %arg2[%c24] : memref<64xf32, #tpu.memory_space<smem>>
    %c24_i32 = arith.constant 24 : i32
    %174 = vector.broadcast %c24_i32 : i32 to vector<8x256xi32>
    %175 = arith.cmpi eq, %116, %174 : vector<8x256xi32>
    %cst_30 = arith.constant 0.000000e+00 : f32
    %176 = vector.broadcast %173 : f32 to vector<8x256xf32>
    %177 = vector.broadcast %cst_30 : f32 to vector<8x256xf32>
    %178 = arith.select %175, %176, %177 : vector<8x256xi1>, vector<8x256xf32>
    %179 = arith.addf %172, %178 : vector<8x256xf32>
    %c25 = arith.constant 25 : index
    %180 = memref.load %arg2[%c25] : memref<64xf32, #tpu.memory_space<smem>>
    %c25_i32 = arith.constant 25 : i32
    %181 = vector.broadcast %c25_i32 : i32 to vector<8x256xi32>
    %182 = arith.cmpi eq, %116, %181 : vector<8x256xi32>
    %cst_31 = arith.constant 0.000000e+00 : f32
    %183 = vector.broadcast %180 : f32 to vector<8x256xf32>
    %184 = vector.broadcast %cst_31 : f32 to vector<8x256xf32>
    %185 = arith.select %182, %183, %184 : vector<8x256xi1>, vector<8x256xf32>
    %186 = arith.addf %179, %185 : vector<8x256xf32>
    %c26 = arith.constant 26 : index
    %187 = memref.load %arg2[%c26] : memref<64xf32, #tpu.memory_space<smem>>
    %c26_i32 = arith.constant 26 : i32
    %188 = vector.broadcast %c26_i32 : i32 to vector<8x256xi32>
    %189 = arith.cmpi eq, %116, %188 : vector<8x256xi32>
    %cst_32 = arith.constant 0.000000e+00 : f32
    %190 = vector.broadcast %187 : f32 to vector<8x256xf32>
    %191 = vector.broadcast %cst_32 : f32 to vector<8x256xf32>
    %192 = arith.select %189, %190, %191 : vector<8x256xi1>, vector<8x256xf32>
    %193 = arith.addf %186, %192 : vector<8x256xf32>
    %c27 = arith.constant 27 : index
    %194 = memref.load %arg2[%c27] : memref<64xf32, #tpu.memory_space<smem>>
    %c27_i32 = arith.constant 27 : i32
    %195 = vector.broadcast %c27_i32 : i32 to vector<8x256xi32>
    %196 = arith.cmpi eq, %116, %195 : vector<8x256xi32>
    %cst_33 = arith.constant 0.000000e+00 : f32
    %197 = vector.broadcast %194 : f32 to vector<8x256xf32>
    %198 = vector.broadcast %cst_33 : f32 to vector<8x256xf32>
    %199 = arith.select %196, %197, %198 : vector<8x256xi1>, vector<8x256xf32>
    %200 = arith.addf %193, %199 : vector<8x256xf32>
    %c28 = arith.constant 28 : index
    %201 = memref.load %arg2[%c28] : memref<64xf32, #tpu.memory_space<smem>>
    %c28_i32 = arith.constant 28 : i32
    %202 = vector.broadcast %c28_i32 : i32 to vector<8x256xi32>
    %203 = arith.cmpi eq, %116, %202 : vector<8x256xi32>
    %cst_34 = arith.constant 0.000000e+00 : f32
    %204 = vector.broadcast %201 : f32 to vector<8x256xf32>
    %205 = vector.broadcast %cst_34 : f32 to vector<8x256xf32>
    %206 = arith.select %203, %204, %205 : vector<8x256xi1>, vector<8x256xf32>
    %207 = arith.addf %200, %206 : vector<8x256xf32>
    %c29 = arith.constant 29 : index
    %208 = memref.load %arg2[%c29] : memref<64xf32, #tpu.memory_space<smem>>
    %c29_i32 = arith.constant 29 : i32
    %209 = vector.broadcast %c29_i32 : i32 to vector<8x256xi32>
    %210 = arith.cmpi eq, %116, %209 : vector<8x256xi32>
    %cst_35 = arith.constant 0.000000e+00 : f32
    %211 = vector.broadcast %208 : f32 to vector<8x256xf32>
    %212 = vector.broadcast %cst_35 : f32 to vector<8x256xf32>
    %213 = arith.select %210, %211, %212 : vector<8x256xi1>, vector<8x256xf32>
    %214 = arith.addf %207, %213 : vector<8x256xf32>
    %c30 = arith.constant 30 : index
    %215 = memref.load %arg2[%c30] : memref<64xf32, #tpu.memory_space<smem>>
    %c30_i32 = arith.constant 30 : i32
    %216 = vector.broadcast %c30_i32 : i32 to vector<8x256xi32>
    %217 = arith.cmpi eq, %116, %216 : vector<8x256xi32>
    %cst_36 = arith.constant 0.000000e+00 : f32
    %218 = vector.broadcast %215 : f32 to vector<8x256xf32>
    %219 = vector.broadcast %cst_36 : f32 to vector<8x256xf32>
    %220 = arith.select %217, %218, %219 : vector<8x256xi1>, vector<8x256xf32>
    %221 = arith.addf %214, %220 : vector<8x256xf32>
    %c31 = arith.constant 31 : index
    %222 = memref.load %arg2[%c31] : memref<64xf32, #tpu.memory_space<smem>>
    %c31_i32 = arith.constant 31 : i32
    %223 = vector.broadcast %c31_i32 : i32 to vector<8x256xi32>
    %224 = arith.cmpi eq, %116, %223 : vector<8x256xi32>
    %cst_37 = arith.constant 0.000000e+00 : f32
    %225 = vector.broadcast %222 : f32 to vector<8x256xf32>
    %226 = vector.broadcast %cst_37 : f32 to vector<8x256xf32>
    %227 = arith.select %224, %225, %226 : vector<8x256xi1>, vector<8x256xf32>
    %228 = arith.addf %221, %227 : vector<8x256xf32>
    %c2_38 = arith.constant 2 : index
    %c0_39 = arith.constant 0 : index
    %c0_40 = arith.constant 0 : index
    %229 = vector.load %arg1[%c2_38, %c0_39, %c0_40] : memref<4x8x256xi32, #tpu.memory_space<vmem>>, vector<1x8x256xi32>
    %230 = vector.shape_cast %229 : vector<1x8x256xi32> to vector<8x256xi32>
    %c32 = arith.constant 32 : index
    %231 = memref.load %arg2[%c32] : memref<64xf32, #tpu.memory_space<smem>>
    %c32_i32 = arith.constant 32 : i32
    %232 = vector.broadcast %c32_i32 : i32 to vector<8x256xi32>
    %233 = arith.cmpi eq, %230, %232 : vector<8x256xi32>
    %cst_41 = arith.constant 0.000000e+00 : f32
    %234 = vector.broadcast %231 : f32 to vector<8x256xf32>
    %235 = vector.broadcast %cst_41 : f32 to vector<8x256xf32>
    %236 = arith.select %233, %234, %235 : vector<8x256xi1>, vector<8x256xf32>
    %237 = arith.addf %228, %236 : vector<8x256xf32>
    %c33 = arith.constant 33 : index
    %238 = memref.load %arg2[%c33] : memref<64xf32, #tpu.memory_space<smem>>
    %c33_i32 = arith.constant 33 : i32
    %239 = vector.broadcast %c33_i32 : i32 to vector<8x256xi32>
    %240 = arith.cmpi eq, %230, %239 : vector<8x256xi32>
    %cst_42 = arith.constant 0.000000e+00 : f32
    %241 = vector.broadcast %238 : f32 to vector<8x256xf32>
    %242 = vector.broadcast %cst_42 : f32 to vector<8x256xf32>
    %243 = arith.select %240, %241, %242 : vector<8x256xi1>, vector<8x256xf32>
    %244 = arith.addf %237, %243 : vector<8x256xf32>
    %c34 = arith.constant 34 : index
    %245 = memref.load %arg2[%c34] : memref<64xf32, #tpu.memory_space<smem>>
    %c34_i32 = arith.constant 34 : i32
    %246 = vector.broadcast %c34_i32 : i32 to vector<8x256xi32>
    %247 = arith.cmpi eq, %230, %246 : vector<8x256xi32>
    %cst_43 = arith.constant 0.000000e+00 : f32
    %248 = vector.broadcast %245 : f32 to vector<8x256xf32>
    %249 = vector.broadcast %cst_43 : f32 to vector<8x256xf32>
    %250 = arith.select %247, %248, %249 : vector<8x256xi1>, vector<8x256xf32>
    %251 = arith.addf %244, %250 : vector<8x256xf32>
    %c35 = arith.constant 35 : index
    %252 = memref.load %arg2[%c35] : memref<64xf32, #tpu.memory_space<smem>>
    %c35_i32 = arith.constant 35 : i32
    %253 = vector.broadcast %c35_i32 : i32 to vector<8x256xi32>
    %254 = arith.cmpi eq, %230, %253 : vector<8x256xi32>
    %cst_44 = arith.constant 0.000000e+00 : f32
    %255 = vector.broadcast %252 : f32 to vector<8x256xf32>
    %256 = vector.broadcast %cst_44 : f32 to vector<8x256xf32>
    %257 = arith.select %254, %255, %256 : vector<8x256xi1>, vector<8x256xf32>
    %258 = arith.addf %251, %257 : vector<8x256xf32>
    %c36 = arith.constant 36 : index
    %259 = memref.load %arg2[%c36] : memref<64xf32, #tpu.memory_space<smem>>
    %c36_i32 = arith.constant 36 : i32
    %260 = vector.broadcast %c36_i32 : i32 to vector<8x256xi32>
    %261 = arith.cmpi eq, %230, %260 : vector<8x256xi32>
    %cst_45 = arith.constant 0.000000e+00 : f32
    %262 = vector.broadcast %259 : f32 to vector<8x256xf32>
    %263 = vector.broadcast %cst_45 : f32 to vector<8x256xf32>
    %264 = arith.select %261, %262, %263 : vector<8x256xi1>, vector<8x256xf32>
    %265 = arith.addf %258, %264 : vector<8x256xf32>
    %c37 = arith.constant 37 : index
    %266 = memref.load %arg2[%c37] : memref<64xf32, #tpu.memory_space<smem>>
    %c37_i32 = arith.constant 37 : i32
    %267 = vector.broadcast %c37_i32 : i32 to vector<8x256xi32>
    %268 = arith.cmpi eq, %230, %267 : vector<8x256xi32>
    %cst_46 = arith.constant 0.000000e+00 : f32
    %269 = vector.broadcast %266 : f32 to vector<8x256xf32>
    %270 = vector.broadcast %cst_46 : f32 to vector<8x256xf32>
    %271 = arith.select %268, %269, %270 : vector<8x256xi1>, vector<8x256xf32>
    %272 = arith.addf %265, %271 : vector<8x256xf32>
    %c38 = arith.constant 38 : index
    %273 = memref.load %arg2[%c38] : memref<64xf32, #tpu.memory_space<smem>>
    %c38_i32 = arith.constant 38 : i32
    %274 = vector.broadcast %c38_i32 : i32 to vector<8x256xi32>
    %275 = arith.cmpi eq, %230, %274 : vector<8x256xi32>
    %cst_47 = arith.constant 0.000000e+00 : f32
    %276 = vector.broadcast %273 : f32 to vector<8x256xf32>
    %277 = vector.broadcast %cst_47 : f32 to vector<8x256xf32>
    %278 = arith.select %275, %276, %277 : vector<8x256xi1>, vector<8x256xf32>
    %279 = arith.addf %272, %278 : vector<8x256xf32>
    %c39 = arith.constant 39 : index
    %280 = memref.load %arg2[%c39] : memref<64xf32, #tpu.memory_space<smem>>
    %c39_i32 = arith.constant 39 : i32
    %281 = vector.broadcast %c39_i32 : i32 to vector<8x256xi32>
    %282 = arith.cmpi eq, %230, %281 : vector<8x256xi32>
    %cst_48 = arith.constant 0.000000e+00 : f32
    %283 = vector.broadcast %280 : f32 to vector<8x256xf32>
    %284 = vector.broadcast %cst_48 : f32 to vector<8x256xf32>
    %285 = arith.select %282, %283, %284 : vector<8x256xi1>, vector<8x256xf32>
    %286 = arith.addf %279, %285 : vector<8x256xf32>
    %c40 = arith.constant 40 : index
    %287 = memref.load %arg2[%c40] : memref<64xf32, #tpu.memory_space<smem>>
    %c40_i32 = arith.constant 40 : i32
    %288 = vector.broadcast %c40_i32 : i32 to vector<8x256xi32>
    %289 = arith.cmpi eq, %230, %288 : vector<8x256xi32>
    %cst_49 = arith.constant 0.000000e+00 : f32
    %290 = vector.broadcast %287 : f32 to vector<8x256xf32>
    %291 = vector.broadcast %cst_49 : f32 to vector<8x256xf32>
    %292 = arith.select %289, %290, %291 : vector<8x256xi1>, vector<8x256xf32>
    %293 = arith.addf %286, %292 : vector<8x256xf32>
    %c41 = arith.constant 41 : index
    %294 = memref.load %arg2[%c41] : memref<64xf32, #tpu.memory_space<smem>>
    %c41_i32 = arith.constant 41 : i32
    %295 = vector.broadcast %c41_i32 : i32 to vector<8x256xi32>
    %296 = arith.cmpi eq, %230, %295 : vector<8x256xi32>
    %cst_50 = arith.constant 0.000000e+00 : f32
    %297 = vector.broadcast %294 : f32 to vector<8x256xf32>
    %298 = vector.broadcast %cst_50 : f32 to vector<8x256xf32>
    %299 = arith.select %296, %297, %298 : vector<8x256xi1>, vector<8x256xf32>
    %300 = arith.addf %293, %299 : vector<8x256xf32>
    %c42 = arith.constant 42 : index
    %301 = memref.load %arg2[%c42] : memref<64xf32, #tpu.memory_space<smem>>
    %c42_i32 = arith.constant 42 : i32
    %302 = vector.broadcast %c42_i32 : i32 to vector<8x256xi32>
    %303 = arith.cmpi eq, %230, %302 : vector<8x256xi32>
    %cst_51 = arith.constant 0.000000e+00 : f32
    %304 = vector.broadcast %301 : f32 to vector<8x256xf32>
    %305 = vector.broadcast %cst_51 : f32 to vector<8x256xf32>
    %306 = arith.select %303, %304, %305 : vector<8x256xi1>, vector<8x256xf32>
    %307 = arith.addf %300, %306 : vector<8x256xf32>
    %c43 = arith.constant 43 : index
    %308 = memref.load %arg2[%c43] : memref<64xf32, #tpu.memory_space<smem>>
    %c43_i32 = arith.constant 43 : i32
    %309 = vector.broadcast %c43_i32 : i32 to vector<8x256xi32>
    %310 = arith.cmpi eq, %230, %309 : vector<8x256xi32>
    %cst_52 = arith.constant 0.000000e+00 : f32
    %311 = vector.broadcast %308 : f32 to vector<8x256xf32>
    %312 = vector.broadcast %cst_52 : f32 to vector<8x256xf32>
    %313 = arith.select %310, %311, %312 : vector<8x256xi1>, vector<8x256xf32>
    %314 = arith.addf %307, %313 : vector<8x256xf32>
    %c44 = arith.constant 44 : index
    %315 = memref.load %arg2[%c44] : memref<64xf32, #tpu.memory_space<smem>>
    %c44_i32 = arith.constant 44 : i32
    %316 = vector.broadcast %c44_i32 : i32 to vector<8x256xi32>
    %317 = arith.cmpi eq, %230, %316 : vector<8x256xi32>
    %cst_53 = arith.constant 0.000000e+00 : f32
    %318 = vector.broadcast %315 : f32 to vector<8x256xf32>
    %319 = vector.broadcast %cst_53 : f32 to vector<8x256xf32>
    %320 = arith.select %317, %318, %319 : vector<8x256xi1>, vector<8x256xf32>
    %321 = arith.addf %314, %320 : vector<8x256xf32>
    %c45 = arith.constant 45 : index
    %322 = memref.load %arg2[%c45] : memref<64xf32, #tpu.memory_space<smem>>
    %c45_i32 = arith.constant 45 : i32
    %323 = vector.broadcast %c45_i32 : i32 to vector<8x256xi32>
    %324 = arith.cmpi eq, %230, %323 : vector<8x256xi32>
    %cst_54 = arith.constant 0.000000e+00 : f32
    %325 = vector.broadcast %322 : f32 to vector<8x256xf32>
    %326 = vector.broadcast %cst_54 : f32 to vector<8x256xf32>
    %327 = arith.select %324, %325, %326 : vector<8x256xi1>, vector<8x256xf32>
    %328 = arith.addf %321, %327 : vector<8x256xf32>
    %c46 = arith.constant 46 : index
    %329 = memref.load %arg2[%c46] : memref<64xf32, #tpu.memory_space<smem>>
    %c46_i32 = arith.constant 46 : i32
    %330 = vector.broadcast %c46_i32 : i32 to vector<8x256xi32>
    %331 = arith.cmpi eq, %230, %330 : vector<8x256xi32>
    %cst_55 = arith.constant 0.000000e+00 : f32
    %332 = vector.broadcast %329 : f32 to vector<8x256xf32>
    %333 = vector.broadcast %cst_55 : f32 to vector<8x256xf32>
    %334 = arith.select %331, %332, %333 : vector<8x256xi1>, vector<8x256xf32>
    %335 = arith.addf %328, %334 : vector<8x256xf32>
    %c47 = arith.constant 47 : index
    %336 = memref.load %arg2[%c47] : memref<64xf32, #tpu.memory_space<smem>>
    %c47_i32 = arith.constant 47 : i32
    %337 = vector.broadcast %c47_i32 : i32 to vector<8x256xi32>
    %338 = arith.cmpi eq, %230, %337 : vector<8x256xi32>
    %cst_56 = arith.constant 0.000000e+00 : f32
    %339 = vector.broadcast %336 : f32 to vector<8x256xf32>
    %340 = vector.broadcast %cst_56 : f32 to vector<8x256xf32>
    %341 = arith.select %338, %339, %340 : vector<8x256xi1>, vector<8x256xf32>
    %342 = arith.addf %335, %341 : vector<8x256xf32>
    %c3_57 = arith.constant 3 : index
    %c0_58 = arith.constant 0 : index
    %c0_59 = arith.constant 0 : index
    %343 = vector.load %arg1[%c3_57, %c0_58, %c0_59] : memref<4x8x256xi32, #tpu.memory_space<vmem>>, vector<1x8x256xi32>
    %344 = vector.shape_cast %343 : vector<1x8x256xi32> to vector<8x256xi32>
    %c48 = arith.constant 48 : index
    %345 = memref.load %arg2[%c48] : memref<64xf32, #tpu.memory_space<smem>>
    %c48_i32 = arith.constant 48 : i32
    %346 = vector.broadcast %c48_i32 : i32 to vector<8x256xi32>
    %347 = arith.cmpi eq, %344, %346 : vector<8x256xi32>
    %cst_60 = arith.constant 0.000000e+00 : f32
    %348 = vector.broadcast %345 : f32 to vector<8x256xf32>
    %349 = vector.broadcast %cst_60 : f32 to vector<8x256xf32>
    %350 = arith.select %347, %348, %349 : vector<8x256xi1>, vector<8x256xf32>
    %351 = arith.addf %342, %350 : vector<8x256xf32>
    %c49 = arith.constant 49 : index
    %352 = memref.load %arg2[%c49] : memref<64xf32, #tpu.memory_space<smem>>
    %c49_i32 = arith.constant 49 : i32
    %353 = vector.broadcast %c49_i32 : i32 to vector<8x256xi32>
    %354 = arith.cmpi eq, %344, %353 : vector<8x256xi32>
    %cst_61 = arith.constant 0.000000e+00 : f32
    %355 = vector.broadcast %352 : f32 to vector<8x256xf32>
    %356 = vector.broadcast %cst_61 : f32 to vector<8x256xf32>
    %357 = arith.select %354, %355, %356 : vector<8x256xi1>, vector<8x256xf32>
    %358 = arith.addf %351, %357 : vector<8x256xf32>
    %c50 = arith.constant 50 : index
    %359 = memref.load %arg2[%c50] : memref<64xf32, #tpu.memory_space<smem>>
    %c50_i32 = arith.constant 50 : i32
    %360 = vector.broadcast %c50_i32 : i32 to vector<8x256xi32>
    %361 = arith.cmpi eq, %344, %360 : vector<8x256xi32>
    %cst_62 = arith.constant 0.000000e+00 : f32
    %362 = vector.broadcast %359 : f32 to vector<8x256xf32>
    %363 = vector.broadcast %cst_62 : f32 to vector<8x256xf32>
    %364 = arith.select %361, %362, %363 : vector<8x256xi1>, vector<8x256xf32>
    %365 = arith.addf %358, %364 : vector<8x256xf32>
    %c51 = arith.constant 51 : index
    %366 = memref.load %arg2[%c51] : memref<64xf32, #tpu.memory_space<smem>>
    %c51_i32 = arith.constant 51 : i32
    %367 = vector.broadcast %c51_i32 : i32 to vector<8x256xi32>
    %368 = arith.cmpi eq, %344, %367 : vector<8x256xi32>
    %cst_63 = arith.constant 0.000000e+00 : f32
    %369 = vector.broadcast %366 : f32 to vector<8x256xf32>
    %370 = vector.broadcast %cst_63 : f32 to vector<8x256xf32>
    %371 = arith.select %368, %369, %370 : vector<8x256xi1>, vector<8x256xf32>
    %372 = arith.addf %365, %371 : vector<8x256xf32>
    %c52 = arith.constant 52 : index
    %373 = memref.load %arg2[%c52] : memref<64xf32, #tpu.memory_space<smem>>
    %c52_i32 = arith.constant 52 : i32
    %374 = vector.broadcast %c52_i32 : i32 to vector<8x256xi32>
    %375 = arith.cmpi eq, %344, %374 : vector<8x256xi32>
    %cst_64 = arith.constant 0.000000e+00 : f32
    %376 = vector.broadcast %373 : f32 to vector<8x256xf32>
    %377 = vector.broadcast %cst_64 : f32 to vector<8x256xf32>
    %378 = arith.select %375, %376, %377 : vector<8x256xi1>, vector<8x256xf32>
    %379 = arith.addf %372, %378 : vector<8x256xf32>
    %c53 = arith.constant 53 : index
    %380 = memref.load %arg2[%c53] : memref<64xf32, #tpu.memory_space<smem>>
    %c53_i32 = arith.constant 53 : i32
    %381 = vector.broadcast %c53_i32 : i32 to vector<8x256xi32>
    %382 = arith.cmpi eq, %344, %381 : vector<8x256xi32>
    %cst_65 = arith.constant 0.000000e+00 : f32
    %383 = vector.broadcast %380 : f32 to vector<8x256xf32>
    %384 = vector.broadcast %cst_65 : f32 to vector<8x256xf32>
    %385 = arith.select %382, %383, %384 : vector<8x256xi1>, vector<8x256xf32>
    %386 = arith.addf %379, %385 : vector<8x256xf32>
    %c54 = arith.constant 54 : index
    %387 = memref.load %arg2[%c54] : memref<64xf32, #tpu.memory_space<smem>>
    %c54_i32 = arith.constant 54 : i32
    %388 = vector.broadcast %c54_i32 : i32 to vector<8x256xi32>
    %389 = arith.cmpi eq, %344, %388 : vector<8x256xi32>
    %cst_66 = arith.constant 0.000000e+00 : f32
    %390 = vector.broadcast %387 : f32 to vector<8x256xf32>
    %391 = vector.broadcast %cst_66 : f32 to vector<8x256xf32>
    %392 = arith.select %389, %390, %391 : vector<8x256xi1>, vector<8x256xf32>
    %393 = arith.addf %386, %392 : vector<8x256xf32>
    %c55 = arith.constant 55 : index
    %394 = memref.load %arg2[%c55] : memref<64xf32, #tpu.memory_space<smem>>
    %c55_i32 = arith.constant 55 : i32
    %395 = vector.broadcast %c55_i32 : i32 to vector<8x256xi32>
    %396 = arith.cmpi eq, %344, %395 : vector<8x256xi32>
    %cst_67 = arith.constant 0.000000e+00 : f32
    %397 = vector.broadcast %394 : f32 to vector<8x256xf32>
    %398 = vector.broadcast %cst_67 : f32 to vector<8x256xf32>
    %399 = arith.select %396, %397, %398 : vector<8x256xi1>, vector<8x256xf32>
    %400 = arith.addf %393, %399 : vector<8x256xf32>
    %c56 = arith.constant 56 : index
    %401 = memref.load %arg2[%c56] : memref<64xf32, #tpu.memory_space<smem>>
    %c56_i32 = arith.constant 56 : i32
    %402 = vector.broadcast %c56_i32 : i32 to vector<8x256xi32>
    %403 = arith.cmpi eq, %344, %402 : vector<8x256xi32>
    %cst_68 = arith.constant 0.000000e+00 : f32
    %404 = vector.broadcast %401 : f32 to vector<8x256xf32>
    %405 = vector.broadcast %cst_68 : f32 to vector<8x256xf32>
    %406 = arith.select %403, %404, %405 : vector<8x256xi1>, vector<8x256xf32>
    %407 = arith.addf %400, %406 : vector<8x256xf32>
    %c57 = arith.constant 57 : index
    %408 = memref.load %arg2[%c57] : memref<64xf32, #tpu.memory_space<smem>>
    %c57_i32 = arith.constant 57 : i32
    %409 = vector.broadcast %c57_i32 : i32 to vector<8x256xi32>
    %410 = arith.cmpi eq, %344, %409 : vector<8x256xi32>
    %cst_69 = arith.constant 0.000000e+00 : f32
    %411 = vector.broadcast %408 : f32 to vector<8x256xf32>
    %412 = vector.broadcast %cst_69 : f32 to vector<8x256xf32>
    %413 = arith.select %410, %411, %412 : vector<8x256xi1>, vector<8x256xf32>
    %414 = arith.addf %407, %413 : vector<8x256xf32>
    %c58 = arith.constant 58 : index
    %415 = memref.load %arg2[%c58] : memref<64xf32, #tpu.memory_space<smem>>
    %c58_i32 = arith.constant 58 : i32
    %416 = vector.broadcast %c58_i32 : i32 to vector<8x256xi32>
    %417 = arith.cmpi eq, %344, %416 : vector<8x256xi32>
    %cst_70 = arith.constant 0.000000e+00 : f32
    %418 = vector.broadcast %415 : f32 to vector<8x256xf32>
    %419 = vector.broadcast %cst_70 : f32 to vector<8x256xf32>
    %420 = arith.select %417, %418, %419 : vector<8x256xi1>, vector<8x256xf32>
    %421 = arith.addf %414, %420 : vector<8x256xf32>
    %c59 = arith.constant 59 : index
    %422 = memref.load %arg2[%c59] : memref<64xf32, #tpu.memory_space<smem>>
    %c59_i32 = arith.constant 59 : i32
    %423 = vector.broadcast %c59_i32 : i32 to vector<8x256xi32>
    %424 = arith.cmpi eq, %344, %423 : vector<8x256xi32>
    %cst_71 = arith.constant 0.000000e+00 : f32
    %425 = vector.broadcast %422 : f32 to vector<8x256xf32>
    %426 = vector.broadcast %cst_71 : f32 to vector<8x256xf32>
    %427 = arith.select %424, %425, %426 : vector<8x256xi1>, vector<8x256xf32>
    %428 = arith.addf %421, %427 : vector<8x256xf32>
    %c60 = arith.constant 60 : index
    %429 = memref.load %arg2[%c60] : memref<64xf32, #tpu.memory_space<smem>>
    %c60_i32 = arith.constant 60 : i32
    %430 = vector.broadcast %c60_i32 : i32 to vector<8x256xi32>
    %431 = arith.cmpi eq, %344, %430 : vector<8x256xi32>
    %cst_72 = arith.constant 0.000000e+00 : f32
    %432 = vector.broadcast %429 : f32 to vector<8x256xf32>
    %433 = vector.broadcast %cst_72 : f32 to vector<8x256xf32>
    %434 = arith.select %431, %432, %433 : vector<8x256xi1>, vector<8x256xf32>
    %435 = arith.addf %428, %434 : vector<8x256xf32>
    %c61 = arith.constant 61 : index
    %436 = memref.load %arg2[%c61] : memref<64xf32, #tpu.memory_space<smem>>
    %c61_i32 = arith.constant 61 : i32
    %437 = vector.broadcast %c61_i32 : i32 to vector<8x256xi32>
    %438 = arith.cmpi eq, %344, %437 : vector<8x256xi32>
    %cst_73 = arith.constant 0.000000e+00 : f32
    %439 = vector.broadcast %436 : f32 to vector<8x256xf32>
    %440 = vector.broadcast %cst_73 : f32 to vector<8x256xf32>
    %441 = arith.select %438, %439, %440 : vector<8x256xi1>, vector<8x256xf32>
    %442 = arith.addf %435, %441 : vector<8x256xf32>
    %c62 = arith.constant 62 : index
    %443 = memref.load %arg2[%c62] : memref<64xf32, #tpu.memory_space<smem>>
    %c62_i32 = arith.constant 62 : i32
    %444 = vector.broadcast %c62_i32 : i32 to vector<8x256xi32>
    %445 = arith.cmpi eq, %344, %444 : vector<8x256xi32>
    %cst_74 = arith.constant 0.000000e+00 : f32
    %446 = vector.broadcast %443 : f32 to vector<8x256xf32>
    %447 = vector.broadcast %cst_74 : f32 to vector<8x256xf32>
    %448 = arith.select %445, %446, %447 : vector<8x256xi1>, vector<8x256xf32>
    %449 = arith.addf %442, %448 : vector<8x256xf32>
    %c63 = arith.constant 63 : index
    %450 = memref.load %arg2[%c63] : memref<64xf32, #tpu.memory_space<smem>>
    %c63_i32 = arith.constant 63 : i32
    %451 = vector.broadcast %c63_i32 : i32 to vector<8x256xi32>
    %452 = arith.cmpi eq, %344, %451 : vector<8x256xi32>
    %cst_75 = arith.constant 0.000000e+00 : f32
    %453 = vector.broadcast %450 : f32 to vector<8x256xf32>
    %454 = vector.broadcast %cst_75 : f32 to vector<8x256xf32>
    %455 = arith.select %452, %453, %454 : vector<8x256xi1>, vector<8x256xf32>
    %456 = arith.addf %449, %455 : vector<8x256xf32>
    %c0_76 = arith.constant 0 : index
    %c0_77 = arith.constant 0 : index
    %457 = vector.load %arg3[%c0_76, %c0_77] : memref<8x256xf32, #tpu.memory_space<vmem>>, vector<8x256xf32>
    tpu.vector_store %arg3[%c0_76, %c0_77], %456 {strides = array<i32>} : memref<8x256xf32, #tpu.memory_space<vmem>>, vector<8x256xf32>,
    return
  }
  func.func @transform_0(%arg0: i32) -> (i32, i32, i32) {
    %c0_i32 = arith.constant 0 : i32
    %c0_i32_0 = arith.constant 0 : i32
    %c0_i32_1 = arith.constant 0 : i32
    return %c0_i32, %arg0, %c0_i32_0 : i32, i32, i32
  }
  func.func @transform_1(%arg0: i32) -> i32 {
    %c0_i32 = arith.constant 0 : i32
    %c0_i32_0 = arith.constant 0 : i32
    return %c0_i32 : i32
  }
  func.func @transform_2(%arg0: i32) -> (i32, i32) {
    %c0_i32 = arith.constant 0 : i32
    %c0_i32_0 = arith.constant 0 : i32
    return %arg0, %c0_i32 : i32, i32
  }
}

</mosaic_0001>

<bundles_post_ra>
// kernel: tpu_custom_call.1
= control target key start
LH: loop header
LB: loop body
LE: loop exit
PB: predicated region body
PF: predicated region fallthrough
CT: control target
= control target key end

     0   :  { %7 = vsyncpa [#allocation3], 0  ;;  %s1114_s0 = inlined_call_operand.hbm [shape: s32[4,8,256], index: 0, kind: input, shape index: {}]   ;;  %s1115_s1 = inlined_call_operand.vmem [shape: f32[64], index: 1, kind: input, shape index: {}]   ;;  %s1116_s2 = inlined_call_operand.hbm [shape: f32[8,256], index: 2, kind: output, shape index: {}]  }
   0x1   :  { %8 = vsyncpa [#allocation5], 0 }
   0x2   :  { %9 = vsyncpa [#allocation4], 0  ;;  %s710_s9 = smov [#allocation2]   ;;  %s28_s13 = sshll.u32 %s1115_s1, 4  ;;  %s29_s13 = int_to_ptr.vmem [resolvable:$true] %s28_s13 }
   0x3   :  { %s15_s10 = sshll.u32 %s710_s9, 4  ;;  %s648_s16 = scalar_lea.hbm %s1114_s0, 1024  ;;  %s16_s10 = int_to_ptr.vmem [resolvable:$true] %s15_s10 }
   0x4   :  { %p649_p0 = scmp.ne.s32.totalorder %s1114_s0, %s648_s16  ;;  %p652_p1 = scmp.lt.u32.totalorder %s648_s16, %s1114_s0 }
   0x6   :  { %p654_p2 = pnand %p652_p1, %p649_p0 }
   0x8   :  { %657 = shalt.err (!%p654_p2)
}
   0x9   :  { %s658_s21 = scalar_lea.vmem %s16_s10, 1024  ;;  %p663_p4 = scmp.lt.s32.totalorder %s16_s10, %s16_s10 }
   0xa   :  { %p659_p3 = scmp.ne.s32.totalorder %s16_s10, %s658_s21  ;;  %p664_p5 = scmp.lt.s32.totalorder %s658_s21, %s658_s21 }
   0xc   :  { %p665_p6 = por %p664_p5, %p663_p4 }
   0xe   :  { %p666_p7 = pnand %p665_p6, %p659_p3 }
  0x10   :  { %669 = shalt.err (!%p666_p7)
}
  0x11   :  { %s711_s1 = smov 256   ;;  %s712_s22 = smov 16  }
  0x12   :  { %21 = dma.hbm_to_vmem [thread:$0]  %s1114_s0, 1024, %s16_s10, [#allocation3], %s711_s1, %s711_s1, %s712_s22  }
  0x13   :  { %s670_s25 = scalar_lea.vmem %s29_s13, 16  ;;  %p675_p9 = scmp.lt.s32.totalorder %s29_s13, %s29_s13 }
  0x14   :  { %p671_p8 = scmp.ne.s32.totalorder %s29_s13, %s670_s25  ;;  %p676_p10 = scmp.lt.s32.totalorder %s670_s25, %s670_s25 }
  0x16   :  { %p677_p11 = por %p676_p10, %p675_p9 }
  0x18   :  { %p678_p12 = pnand %p677_p11, %p671_p8 }
  0x1a   :  { %681 = shalt.err (!%p678_p12)
}
  0x1b   :  { %s713_s26 = smov [#allocation6]  }
  0x1c   :  { %31 = dma.vmem_to_smem %s29_s13, 16, %s713_s26, [#allocation5]  }
  0x1d   :  { %704 = dma.done.wait [#allocation3], 1024  }
  0x1e   :  { %705 = vsyncadd [#allocation3], 4294966272 }
  0x1f   :  { %706 = dma.done.wait [#allocation5], 16  }
  0x20   :  { %707 = vsyncadd [#allocation5], 4294967280 }
  0x21   :  { %38 = sfence }
  0x22   :  { %v745_v0 = vld [vmem:[#allocation2] sm:$0xff]  ;;  %v747_v1 = vld [vmem:[#allocation2 + $0x8] sm:$0xff]  ;;  %s41_s0 = sld [smem:[#allocation6]]  ;;  %s580_s27 = sld [smem:[#allocation6 + $0x1]] }
  0x23   :  { %s581_s28 = sld [smem:[#allocation6 + $0x2]]  ;;  %s749_s29 = sld [smem:[#allocation6 + $0x3]]  ;;  %vm42_vm0 = vcmp.eq.s32.totalorder %v745_v0, 0  ;;  %vm43_vm1 = vcmp.eq.s32.totalorder %v747_v1, 0  ;;  %vm50_vm2 = vcmp.eq.s32.totalorder %v745_v0, 1  ;;  %vm51_vm3 = vcmp.eq.s32.totalorder %v747_v1, 1 }
  0x24   :  { %s753_s30 = sld [smem:[#allocation6 + $0x4]]  ;;  %s755_s3 = sld [smem:[#allocation6 + $0x5]]  ;;  %vm58_vm4 = vcmp.eq.s32.totalorder %v745_v0, 2  ;;  %vm59_vm5 = vcmp.eq.s32.totalorder %v747_v1, 2  ;;  %vm66_vm6 = vcmp.eq.s32.totalorder %v745_v0, 3  ;;  %vm67_vm7 = vcmp.eq.s32.totalorder %v747_v1, 3 }
  0x25   :  { %s761_s4 = sld [smem:[#allocation6 + $0x6]]  ;;  %vm74_vm8 = vcmp.eq.s32.totalorder %v745_v0, 4  ;;  %vm75_vm9 = vcmp.eq.s32.totalorder %v747_v1, 4  ;;  %vm82_vm10 = vcmp.eq.s32.totalorder %v745_v0, 5  ;;  %vm83_vm11 = vcmp.eq.s32.totalorder %v747_v1, 5  ;;  %s769_s5 = sld [smem:[#allocation6 + $0x7]] }
  0x26   :  { %s780_s6 = sld [smem:[#allocation6 + $0x8]]  ;;  %s792_s7 = sld [smem:[#allocation6 + $0x9]]  ;;  %vm90_vm12 = vcmp.eq.s32.totalorder %v745_v0, 6  ;;  %vm91_vm13 = vcmp.eq.s32.totalorder %v747_v1, 6  ;;  %vm98_vm14 = vcmp.eq.s32.totalorder %v745_v0, 7  ;;  %vm99_vm15 = vcmp.eq.s32.totalorder %v747_v1, 7 }
  0x27   :  { %s801_s8 = sld [smem:[#allocation6 + $0xa]]  ;;  %s810_s9 = sld [smem:[#allocation6 + $0xb]] }
  0x28   :  { %v44_v2 = vstv %s41_s0  ;;  %v52_v3 = vstv %s580_s27  ;;  %s815_s10 = sld [smem:[#allocation6 + $0xc]]  ;;  %s820_s11 = sld [smem:[#allocation6 + $0xd]] }
  0x29   :  { %v45_v4 = vsel %vm42_vm0, %v44_v2, 0.0  ;;  %v46_v5 = vsel %vm43_vm1, %v44_v2, 0.0  ;;  %v53_v6 = vsel %vm50_vm2, %v52_v3, 0.0  ;;  %v54_v7 = vsel %vm51_vm3, %v52_v3, 0.0  ;;  %s825_s12 = sld [smem:[#allocation6 + $0xe]]  ;;  %s830_s13 = sld [smem:[#allocation6 + $0xf]] }
  0x2a   :  { %v55_v8 = vadd.f32 %v53_v6, %v45_v4  ;;  %v56_v9 = vadd.f32 %v54_v7, %v46_v5  ;;  %v60_v10 = vstv %s581_s28  ;;  %v68_v11 = vstv %s749_s29  ;;  %s835_s14 = sld [smem:[#allocation6 + $0x10]]  ;;  %s840_s15 = sld [smem:[#allocation6 + $0x11]]  ;;  %v845_v3 = vld [vmem:[#allocation2 + $0x10] sm:$0xff]  ;;  %v850_v6 = vld [vmem:[#allocation2 + $0x18] sm:$0xff] }
  0x2b   :  { %v61_v12 = vsel %vm58_vm4, %v60_v10, 0.0  ;;  %v62_v13 = vsel %vm59_vm5, %v60_v10, 0.0  ;;  %v69_v14 = vsel %vm66_vm6, %v68_v11, 0.0  ;;  %v70_v15 = vsel %vm67_vm7, %v68_v11, 0.0  ;;  %s847_s16 = sld [smem:[#allocation6 + $0x12]]  ;;  %s854_s17 = sld [smem:[#allocation6 + $0x13]] }
  0x2c   :  { %v63_v16 = vadd.f32 %v61_v12, %v55_v8  ;;  %v64_v17 = vadd.f32 %v62_v13, %v56_v9  ;;  %v76_v18 = vstv %s753_s30  ;;  %v84_v19 = vstv %s755_s3  ;;  %s861_s18 = sld [smem:[#allocation6 + $0x14]]  ;;  %s866_s19 = sld [smem:[#allocation6 + $0x15]] }
  0x2d   :  { %v77_v20 = vsel %vm74_vm8, %v76_v18, 0.0  ;;  %v78_v21 = vsel %vm75_vm9, %v76_v18, 0.0  ;;  %v92_v24 = vstv %s761_s4  ;;  %v85_v25 = vsel %vm82_vm10, %v84_v19, 0.0  ;;  %s871_s20 = sld [smem:[#allocation6 + $0x16]]  ;;  %s876_s21 = sld [smem:[#allocation6 + $0x17]] }
  0x2e   :  { %v71_v22 = vadd.f32 %v69_v14, %v63_v16  ;;  %v72_v23 = vadd.f32 %v70_v15, %v64_v17  ;;  %v86_v26 = vsel %vm83_vm11, %v84_v19, 0.0  ;;  %v100_v29 = vstv %s769_s5  ;;  %s881_s1 = sld [smem:[#allocation6 + $0x18]]  ;;  %s886_s22 = sld [smem:[#allocation6 + $0x19]] }
  0x2f   :  { %v93_v30 = vsel %vm90_vm12, %v92_v24, 0.0  ;;  %v94_v31 = vsel %vm91_vm13, %v92_v24, 0.0  ;;  %vm106_vm0 = vcmp.eq.s32.totalorder %v745_v0, 8  ;;  %vm107_vm1 = vcmp.eq.s32.totalorder %v747_v1, 8  ;;  %s891_s23 = sld [smem:[#allocation6 + $0x1a]]  ;;  %s896_s24 = sld [smem:[#allocation6 + $0x1b]] }
  0x30   :  { %v79_v27 = vadd.f32 %v77_v20, %v71_v22  ;;  %v80_v28 = vadd.f32 %v78_v21, %v72_v23  ;;  %v108_v34 = vstv %s780_s6  ;;  %v101_v35 = vsel %vm98_vm14, %v100_v29, 0.0  ;;  %s901_s25 = sld [smem:[#allocation6 + $0x1c]]  ;;  %s906_s26 = sld [smem:[#allocation6 + $0x1d]] }
  0x31   :  { %v102_v36 = vsel %vm99_vm15, %v100_v29, 0.0  ;;  %vm114_vm2 = vcmp.eq.s32.totalorder %v745_v0, 9  ;;  %vm115_vm3 = vcmp.eq.s32.totalorder %v747_v1, 9  ;;  %v116_v39 = vstv %s792_s7  ;;  %s911_s0 = sld [smem:[#allocation6 + $0x1e]]  ;;  %s916_s27 = sld [smem:[#allocation6 + $0x1f]] }
  0x32   :  { %v87_v32 = vadd.f32 %v85_v25, %v79_v27  ;;  %v88_v33 = vadd.f32 %v86_v26, %v80_v28  ;;  %v109_v40 = vsel %vm106_vm0, %v108_v34, 0.0  ;;  %v110_v41 = vsel %vm107_vm1, %v108_v34, 0.0  ;;  %s921_s28 = sld [smem:[#allocation6 + $0x20]]  ;;  %s926_s29 = sld [smem:[#allocation6 + $0x21]] }
  0x33   :  { %vm122_vm4 = vcmp.eq.s32.totalorder %v745_v0, 10  ;;  %vm123_vm5 = vcmp.eq.s32.totalorder %v747_v1, 10  ;;  %v124_v44 = vstv %s801_s8  ;;  %v117_v45 = vsel %vm114_vm2, %v116_v39, 0.0  ;;  %s933_s30 = sld [smem:[#allocation6 + $0x22]]  ;;  %s940_s3 = sld [smem:[#allocation6 + $0x23]] }
  0x34   :  { %v95_v37 = vadd.f32 %v93_v30, %v87_v32  ;;  %v96_v38 = vadd.f32 %v94_v31, %v88_v33  ;;  %v118_v46 = vsel %vm115_vm3, %v116_v39, 0.0  ;;  %vm130_vm6 = vcmp.eq.s32.totalorder %v745_v0, 11  ;;  %s947_s4 = sld [smem:[#allocation6 + $0x24]]  ;;  %s952_s5 = sld [smem:[#allocation6 + $0x25]] }
  0x35   :  { %vm131_vm7 = vcmp.eq.s32.totalorder %v747_v1, 11  ;;  %v132_v49 = vstv %s810_s9  ;;  %v125_v50 = vsel %vm122_vm4, %v124_v44, 0.0  ;;  %v126_v51 = vsel %vm123_vm5, %v124_v44, 0.0  ;;  %s957_s6 = sld [smem:[#allocation6 + $0x26]]  ;;  %s962_s7 = sld [smem:[#allocation6 + $0x27]] }
  0x36   :  { %v103_v42 = vadd.f32 %v101_v35, %v95_v37  ;;  %v104_v43 = vadd.f32 %v102_v36, %v96_v38  ;;  %vm138_vm8 = vcmp.eq.s32.totalorder %v745_v0, 12  ;;  %vm139_vm9 = vcmp.eq.s32.totalorder %v747_v1, 12  ;;  %s967_s8 = sld [smem:[#allocation6 + $0x28]]  ;;  %s972_s9 = sld [smem:[#allocation6 + $0x29]] }
  0x37   :  { %v140_v54 = vstv %s815_s10  ;;  %v133_v55 = vsel %vm130_vm6, %v132_v49, 0.0  ;;  %v134_v56 = vsel %vm131_vm7, %v132_v49, 0.0  ;;  %vm146_vm10 = vcmp.eq.s32.totalorder %v745_v0, 13  ;;  %s977_s10 = sld [smem:[#allocation6 + $0x2a]] }
  0x38   :  { %v111_v47 = vadd.f32 %v109_v40, %v103_v42  ;;  %v112_v48 = vadd.f32 %v110_v41, %v104_v43  ;;  %vm147_vm11 = vcmp.eq.s32.totalorder %v747_v1, 13  ;;  %v148_v59 = vstv %s820_s11  ;;  %s982_s11 = sld [smem:[#allocation6 + $0x2b]] }
  0x39   :  { %v141_v60 = vsel %vm138_vm8, %v140_v54, 0.0  ;;  %v142_v61 = vsel %vm139_vm9, %v140_v54, 0.0  ;;  %vm154_vm12 = vcmp.eq.s32.totalorder %v745_v0, 14  ;;  %vm155_vm13 = vcmp.eq.s32.totalorder %v747_v1, 14 }
  0x3a   :  { %v119_v52 = vadd.f32 %v117_v45, %v111_v47  ;;  %v120_v53 = vadd.f32 %v118_v46, %v112_v48  ;;  %v156_v2 = vstv %s825_s12  ;;  %v149_v4 = vsel %vm146_vm10, %v148_v59, 0.0  ;;  %s987_s12 = sld [smem:[#allocation6 + $0x2c]] }
  0x3b   :  { %v150_v5 = vsel %vm147_vm11, %v148_v59, 0.0  ;;  %vm162_vm14 = vcmp.eq.s32.totalorder %v745_v0, 15  ;;  %vm163_vm15 = vcmp.eq.s32.totalorder %v747_v1, 15  ;;  %v164_v9 = vstv %s830_s13  ;;  %s992_s13 = sld [smem:[#allocation6 + $0x2d]] }
  0x3c   :  { %v127_v57 = vadd.f32 %v125_v50, %v119_v52  ;;  %v128_v58 = vadd.f32 %v126_v51, %v120_v53  ;;  %v157_v10 = vsel %vm154_vm12, %v156_v2, 0.0  ;;  %v158_v11 = vsel %vm155_vm13, %v156_v2, 0.0 }
  0x3d   :  { %vm173_vm0 = vcmp.eq.s32.totalorder %v845_v3, 16  ;;  %vm174_vm1 = vcmp.eq.s32.totalorder %v850_v6, 16  ;;  %v175_v14 = vstv %s835_s14  ;;  %v165_v15 = vsel %vm162_vm14, %v164_v9, 0.0  ;;  %s997_s14 = sld [smem:[#allocation6 + $0x2e]] }
  0x3e   :  { %v135_v62 = vadd.f32 %v133_v55, %v127_v57  ;;  %v136_v63 = vadd.f32 %v134_v56, %v128_v58  ;;  %v166_v1 = vsel %vm163_vm15, %v164_v9, 0.0  ;;  %vm181_vm2 = vcmp.eq.s32.totalorder %v845_v3, 17 }
  0x3f   :  { %vm182_vm3 = vcmp.eq.s32.totalorder %v850_v6, 17  ;;  %v183_v0 = vstv %s840_s15  ;;  %v176_v18 = vsel %vm173_vm0, %v175_v14, 0.0  ;;  %v177_v19 = vsel %vm174_vm1, %v175_v14, 0.0  ;;  %s1002_s15 = sld [smem:[#allocation6 + $0x2f]] }
  0x40   :  { %v143_v7 = vadd.f32 %v141_v60, %v135_v62  ;;  %v144_v8 = vadd.f32 %v142_v61, %v136_v63  ;;  %vm189_vm4 = vcmp.eq.s32.totalorder %v845_v3, 18  ;;  %vm190_vm5 = vcmp.eq.s32.totalorder %v850_v6, 18 }
  0x41   :  { %v191_v22 = vstv %s847_s16  ;;  %v184_v23 = vsel %vm181_vm2, %v183_v0, 0.0  ;;  %v185_v24 = vsel %vm182_vm3, %v183_v0, 0.0  ;;  %vm197_vm6 = vcmp.eq.s32.totalorder %v845_v3, 19  ;;  %s1007_s16 = sld [smem:[#allocation6 + $0x30]] }
  0x42   :  { %v151_v12 = vadd.f32 %v149_v4, %v143_v7  ;;  %v152_v13 = vadd.f32 %v150_v5, %v144_v8  ;;  %vm198_vm7 = vcmp.eq.s32.totalorder %v850_v6, 19  ;;  %v199_v27 = vstv %s854_s17  ;;  %s1012_s17 = sld [smem:[#allocation6 + $0x31]] }
  0x43   :  { %v192_v28 = vsel %vm189_vm4, %v191_v22, 0.0  ;;  %v193_v29 = vsel %vm190_vm5, %v191_v22, 0.0  ;;  %vm205_vm8 = vcmp.eq.s32.totalorder %v845_v3, 20  ;;  %vm206_vm9 = vcmp.eq.s32.totalorder %v850_v6, 20 }
  0x44   :  { %v159_v16 = vadd.f32 %v157_v10, %v151_v12  ;;  %v160_v17 = vadd.f32 %v158_v11, %v152_v13  ;;  %v207_v32 = vstv %s861_s18  ;;  %v200_v33 = vsel %vm197_vm6, %v199_v27, 0.0  ;;  %s1019_s18 = sld [smem:[#allocation6 + $0x32]] }
  0x45   :  { %v201_v34 = vsel %vm198_vm7, %v199_v27, 0.0  ;;  %vm213_vm10 = vcmp.eq.s32.totalorder %v845_v3, 21  ;;  %vm214_vm11 = vcmp.eq.s32.totalorder %v850_v6, 21  ;;  %v215_v37 = vstv %s866_s19  ;;  %s1026_s19 = sld [smem:[#allocation6 + $0x33]] }
  0x46   :  { %v167_v20 = vadd.f32 %v165_v15, %v159_v16  ;;  %v168_v21 = vadd.f32 %v166_v1, %v160_v17  ;;  %v208_v38 = vsel %vm205_vm8, %v207_v32, 0.0  ;;  %v209_v39 = vsel %vm206_vm9, %v207_v32, 0.0 }
  0x47   :  { %vm221_vm12 = vcmp.eq.s32.totalorder %v845_v3, 22  ;;  %vm222_vm13 = vcmp.eq.s32.totalorder %v850_v6, 22  ;;  %v223_v42 = vstv %s871_s20  ;;  %v216_v43 = vsel %vm213_vm10, %v215_v37, 0.0  ;;  %s1033_s20 = sld [smem:[#allocation6 + $0x34]] }
  0x48   :  { %v178_v25 = vadd.f32 %v176_v18, %v167_v20  ;;  %v179_v26 = vadd.f32 %v177_v19, %v168_v21  ;;  %v217_v44 = vsel %vm214_vm11, %v215_v37, 0.0  ;;  %vm229_vm14 = vcmp.eq.s32.totalorder %v845_v3, 23  ;;  %v931_v21 = vld [vmem:[#allocation2 + $0x20] sm:$0xff] }
  0x49   :  { %vm230_vm15 = vcmp.eq.s32.totalorder %v850_v6, 23  ;;  %v231_v47 = vstv %s876_s21  ;;  %v224_v48 = vsel %vm221_vm12, %v223_v42, 0.0  ;;  %v225_v49 = vsel %vm222_vm13, %v223_v42, 0.0  ;;  %s1038_s21 = sld [smem:[#allocation6 + $0x35]] }
  0x4a   :  { %v186_v30 = vadd.f32 %v184_v23, %v178_v25  ;;  %v187_v31 = vadd.f32 %v185_v24, %v179_v26  ;;  %vm237_vm0 = vcmp.eq.s32.totalorder %v845_v3, 24  ;;  %vm238_vm1 = vcmp.eq.s32.totalorder %v850_v6, 24  ;;  %v936_v24 = vld [vmem:[#allocation2 + $0x28] sm:$0xff] }
  0x4b   :  { %v239_v52 = vstv %s881_s1  ;;  %v232_v53 = vsel %vm229_vm14, %v231_v47, 0.0  ;;  %v233_v54 = vsel %vm230_vm15, %v231_v47, 0.0  ;;  %vm245_vm2 = vcmp.eq.s32.totalorder %v845_v3, 25  ;;  %s1043_s1 = sld [smem:[#allocation6 + $0x36]] }
  0x4c   :  { %v194_v35 = vadd.f32 %v192_v28, %v186_v30  ;;  %v195_v36 = vadd.f32 %v193_v29, %v187_v31  ;;  %vm246_vm3 = vcmp.eq.s32.totalorder %v850_v6, 25  ;;  %v247_v57 = vstv %s886_s22  ;;  %s1048_s22 = sld [smem:[#allocation6 + $0x37]] }
  0x4d   :  { %v240_v58 = vsel %vm237_vm0, %v239_v52, 0.0  ;;  %v241_v59 = vsel %vm238_vm1, %v239_v52, 0.0  ;;  %vm253_vm4 = vcmp.eq.s32.totalorder %v845_v3, 26  ;;  %vm254_vm5 = vcmp.eq.s32.totalorder %v850_v6, 26 }
  0x4e   :  { %v202_v40 = vadd.f32 %v200_v33, %v194_v35  ;;  %v203_v41 = vadd.f32 %v201_v34, %v195_v36  ;;  %v255_v62 = vstv %s891_s23  ;;  %v248_v63 = vsel %vm245_vm2, %v247_v57, 0.0  ;;  %s1053_s23 = sld [smem:[#allocation6 + $0x38]] }
  0x4f   :  { %v249_v2 = vsel %vm246_vm3, %v247_v57, 0.0  ;;  %vm261_vm6 = vcmp.eq.s32.totalorder %v845_v3, 27  ;;  %vm262_vm7 = vcmp.eq.s32.totalorder %v850_v6, 27  ;;  %v263_v7 = vstv %s896_s24  ;;  %s1058_s24 = sld [smem:[#allocation6 + $0x39]] }
  0x50   :  { %v210_v45 = vadd.f32 %v208_v38, %v202_v40  ;;  %v211_v46 = vadd.f32 %v209_v39, %v203_v41  ;;  %v256_v8 = vsel %vm253_vm4, %v255_v62, 0.0  ;;  %v257_v9 = vsel %vm254_vm5, %v255_v62, 0.0 }
  0x51   :  { %vm269_vm8 = vcmp.eq.s32.totalorder %v845_v3, 28  ;;  %vm270_vm9 = vcmp.eq.s32.totalorder %v850_v6, 28  ;;  %v271_v12 = vstv %s901_s25  ;;  %v264_v13 = vsel %vm261_vm6, %v263_v7, 0.0  ;;  %s1063_s25 = sld [smem:[#allocation6 + $0x3a]] }
  0x52   :  { %v218_v50 = vadd.f32 %v216_v43, %v210_v45  ;;  %v219_v51 = vadd.f32 %v217_v44, %v211_v46  ;;  %v265_v14 = vsel %vm262_vm7, %v263_v7, 0.0  ;;  %vm277_vm10 = vcmp.eq.s32.totalorder %v845_v3, 29 }
  0x53   :  { %vm278_vm11 = vcmp.eq.s32.totalorder %v850_v6, 29  ;;  %v279_v16 = vstv %s906_s26  ;;  %v272_v17 = vsel %vm269_vm8, %v271_v12, 0.0  ;;  %v273_v0 = vsel %vm270_vm9, %v271_v12, 0.0  ;;  %s1068_s26 = sld [smem:[#allocation6 + $0x3b]] }
  0x54   :  { %v226_v55 = vadd.f32 %v224_v48, %v218_v50  ;;  %v227_v56 = vadd.f32 %v225_v49, %v219_v51  ;;  %vm285_vm12 = vcmp.eq.s32.totalorder %v845_v3, 30  ;;  %vm286_vm13 = vcmp.eq.s32.totalorder %v850_v6, 30 }
  0x55   :  { %v287_v20 = vstv %s911_s0  ;;  %v280_v22 = vsel %vm277_vm10, %v279_v16, 0.0  ;;  %v281_v23 = vsel %vm278_vm11, %v279_v16, 0.0  ;;  %vm293_vm14 = vcmp.eq.s32.totalorder %v845_v3, 31  ;;  %s1073_s0 = sld [smem:[#allocation6 + $0x3c]] }
  0x56   :  { %v234_v60 = vadd.f32 %v232_v53, %v226_v55  ;;  %v235_v61 = vadd.f32 %v233_v54, %v227_v56  ;;  %vm294_vm15 = vcmp.eq.s32.totalorder %v850_v6, 31  ;;  %v295_v27 = vstv %s916_s27  ;;  %s1078_s27 = sld [smem:[#allocation6 + $0x3d]] }
  0x57   :  { %v288_v28 = vsel %vm285_vm12, %v287_v20, 0.0  ;;  %v289_v29 = vsel %vm286_vm13, %v287_v20, 0.0  ;;  %vm304_vm0 = vcmp.eq.s32.totalorder %v931_v21, 32  ;;  %vm305_vm1 = vcmp.eq.s32.totalorder %v936_v24, 32 }
  0x58   :  { %v242_v4 = vadd.f32 %v240_v58, %v234_v60  ;;  %v243_v5 = vadd.f32 %v241_v59, %v235_v61  ;;  %v306_v32 = vstv %s921_s28  ;;  %v296_v33 = vsel %vm293_vm14, %v295_v27, 0.0  ;;  %s1083_s28 = sld [smem:[#allocation6 + $0x3e]] }
  0x59   :  { %v297_v6 = vsel %vm294_vm15, %v295_v27, 0.0  ;;  %vm312_vm2 = vcmp.eq.s32.totalorder %v931_v21, 33  ;;  %vm313_vm3 = vcmp.eq.s32.totalorder %v936_v24, 33  ;;  %v314_v3 = vstv %s926_s29  ;;  %s1088_s29 = sld [smem:[#allocation6 + $0x3f]] }
  0x5a   :  { %v250_v10 = vadd.f32 %v248_v63, %v242_v4  ;;  %v251_v11 = vadd.f32 %v249_v2, %v243_v5  ;;  %v307_v36 = vsel %vm304_vm0, %v306_v32, 0.0  ;;  %v308_v37 = vsel %vm305_vm1, %v306_v32, 0.0 }
  0x5b   :  { %vm320_vm4 = vcmp.eq.s32.totalorder %v931_v21, 34  ;;  %vm321_vm5 = vcmp.eq.s32.totalorder %v936_v24, 34  ;;  %v322_v40 = vstv %s933_s30  ;;  %v315_v41 = vsel %vm312_vm2, %v314_v3, 0.0  ;;  %s714_s30 = smov [#allocation7]  }
  0x5c   :  { %v258_v15 = vadd.f32 %v256_v8, %v250_v10  ;;  %v259_v1 = vadd.f32 %v257_v9, %v251_v11  ;;  %v316_v42 = vsel %vm313_vm3, %v314_v3, 0.0  ;;  %vm328_vm6 = vcmp.eq.s32.totalorder %v931_v21, 35 }
  0x5d   :  { %vm329_vm7 = vcmp.eq.s32.totalorder %v936_v24, 35  ;;  %v330_v45 = vstv %s940_s3  ;;  %v323_v46 = vsel %vm320_vm4, %v322_v40, 0.0  ;;  %v324_v47 = vsel %vm321_vm5, %v322_v40, 0.0  ;;  %s570_s3 = sshll.u32 %s714_s30, 4  ;;  %s571_s3 = int_to_ptr.vmem [resolvable:$true] %s570_s3 }
  0x5e   :  { %v266_v18 = vadd.f32 %v264_v13, %v258_v15  ;;  %v267_v19 = vadd.f32 %v265_v14, %v259_v1  ;;  %vm336_vm8 = vcmp.eq.s32.totalorder %v931_v21, 36  ;;  %vm337_vm9 = vcmp.eq.s32.totalorder %v936_v24, 36  ;;  %p687_p0 = scmp.lt.s32.totalorder %s571_s3, %s571_s3 }
  0x5f   :  { %v338_v50 = vstv %s947_s4  ;;  %v331_v51 = vsel %vm328_vm6, %v330_v45, 0.0  ;;  %v332_v52 = vsel %vm329_vm7, %v330_v45, 0.0  ;;  %vm344_vm10 = vcmp.eq.s32.totalorder %v931_v21, 37  ;;  %s682_s4 = scalar_lea.vmem %s571_s3, 256 }
  0x60   :  { %v274_v25 = vadd.f32 %v272_v17, %v266_v18  ;;  %v275_v26 = vadd.f32 %v273_v0, %v267_v19  ;;  %vm345_vm11 = vcmp.eq.s32.totalorder %v936_v24, 37  ;;  %v346_v55 = vstv %s952_s5  ;;  %p683_p13 = scmp.ne.s32.totalorder %s571_s3, %s682_s4  ;;  %p688_p1 = scmp.lt.s32.totalorder %s682_s4, %s682_s4 }
  0x61   :  { %v339_v56 = vsel %vm336_vm8, %v338_v50, 0.0  ;;  %v340_v57 = vsel %vm337_vm9, %v338_v50, 0.0  ;;  %vm352_vm12 = vcmp.eq.s32.totalorder %v931_v21, 38  ;;  %vm353_vm13 = vcmp.eq.s32.totalorder %v936_v24, 38 }
  0x62   :  { %v282_v30 = vadd.f32 %v280_v22, %v274_v25  ;;  %v283_v31 = vadd.f32 %v281_v23, %v275_v26  ;;  %v354_v60 = vstv %s957_s6  ;;  %v347_v61 = vsel %vm344_vm10, %v346_v55, 0.0  ;;  %p689_p2 = por %p688_p1, %p687_p0 }
  0x63   :  { %v348_v62 = vsel %vm345_vm11, %v346_v55, 0.0  ;;  %vm360_vm14 = vcmp.eq.s32.totalorder %v931_v21, 39  ;;  %vm361_vm15 = vcmp.eq.s32.totalorder %v936_v24, 39  ;;  %v362_v4 = vstv %s962_s7 }
  0x64   :  { %v290_v34 = vadd.f32 %v288_v28, %v282_v30  ;;  %v291_v35 = vadd.f32 %v289_v29, %v283_v31  ;;  %v355_v5 = vsel %vm352_vm12, %v354_v60, 0.0  ;;  %v356_v7 = vsel %vm353_vm13, %v354_v60, 0.0  ;;  %p690_p3 = pnand %p689_p2, %p683_p13 }
  0x65   :  { %vm368_vm0 = vcmp.eq.s32.totalorder %v931_v21, 40  ;;  %vm369_vm1 = vcmp.eq.s32.totalorder %v936_v24, 40  ;;  %v370_v10 = vstv %s967_s8  ;;  %v363_v11 = vsel %vm360_vm14, %v362_v4, 0.0 }
  0x66   :  { %v298_v38 = vadd.f32 %v296_v33, %v290_v34  ;;  %v299_v39 = vadd.f32 %v297_v6, %v291_v35  ;;  %v364_v12 = vsel %vm361_vm15, %v362_v4, 0.0  ;;  %vm376_vm2 = vcmp.eq.s32.totalorder %v931_v21, 41 }
  0x67   :  { %vm377_vm3 = vcmp.eq.s32.totalorder %v936_v24, 41  ;;  %v378_v15 = vstv %s972_s9  ;;  %v371_v1 = vsel %vm368_vm0, %v370_v10, 0.0  ;;  %v372_v16 = vsel %vm369_vm1, %v370_v10, 0.0 }
  0x68   :  { %v309_v43 = vadd.f32 %v307_v36, %v298_v38  ;;  %v310_v44 = vadd.f32 %v308_v37, %v299_v39  ;;  %vm384_vm4 = vcmp.eq.s32.totalorder %v931_v21, 42  ;;  %vm385_vm5 = vcmp.eq.s32.totalorder %v936_v24, 42  ;;  %v1017_v39 = vld [vmem:[#allocation2 + $0x30] sm:$0xff] }
  0x69   :  { %v386_v18 = vstv %s977_s10  ;;  %v379_v19 = vsel %vm376_vm2, %v378_v15, 0.0  ;;  %v380_v20 = vsel %vm377_vm3, %v378_v15, 0.0  ;;  %vm392_vm6 = vcmp.eq.s32.totalorder %v931_v21, 43 }
  0x6a   :  { %v317_v48 = vadd.f32 %v315_v41, %v309_v43  ;;  %v318_v49 = vadd.f32 %v316_v42, %v310_v44  ;;  %vm393_vm7 = vcmp.eq.s32.totalorder %v936_v24, 43  ;;  %v394_v25 = vstv %s982_s11  ;;  %v1022_v42 = vld [vmem:[#allocation2 + $0x38] sm:$0xff] }
  0x6b   :  { %v387_v26 = vsel %vm384_vm4, %v386_v18, 0.0  ;;  %v388_v27 = vsel %vm385_vm5, %v386_v18, 0.0  ;;  %vm400_vm8 = vcmp.eq.s32.totalorder %v931_v21, 44  ;;  %vm401_vm9 = vcmp.eq.s32.totalorder %v936_v24, 44 }
  0x6c   :  { %v325_v53 = vadd.f32 %v323_v46, %v317_v48  ;;  %v326_v54 = vadd.f32 %v324_v47, %v318_v49  ;;  %v402_v30 = vstv %s987_s12  ;;  %v395_v31 = vsel %vm392_vm6, %v394_v25, 0.0 }
  0x6d   :  { %v396_v32 = vsel %vm393_vm7, %v394_v25, 0.0  ;;  %vm408_vm10 = vcmp.eq.s32.totalorder %v931_v21, 45  ;;  %vm409_vm11 = vcmp.eq.s32.totalorder %v936_v24, 45  ;;  %v410_v34 = vstv %s992_s13 }
  0x6e   :  { %v333_v58 = vadd.f32 %v331_v51, %v325_v53  ;;  %v334_v59 = vadd.f32 %v332_v52, %v326_v54  ;;  %v403_v35 = vsel %vm400_vm8, %v402_v30, 0.0  ;;  %v404_v3 = vsel %vm401_vm9, %v402_v30, 0.0 }
  0x6f   :  { %vm416_vm12 = vcmp.eq.s32.totalorder %v931_v21, 46  ;;  %vm417_vm13 = vcmp.eq.s32.totalorder %v936_v24, 46  ;;  %v418_v38 = vstv %s997_s14  ;;  %v411_v40 = vsel %vm408_vm10, %v410_v34, 0.0 }
  0x70   :  { %v341_v63 = vadd.f32 %v339_v56, %v333_v58  ;;  %v342_v2 = vadd.f32 %v340_v57, %v334_v59  ;;  %v412_v41 = vsel %vm409_vm11, %v410_v34, 0.0  ;;  %vm424_vm14 = vcmp.eq.s32.totalorder %v931_v21, 47 }
  0x71   :  { %vm425_vm15 = vcmp.eq.s32.totalorder %v936_v24, 47  ;;  %v426_v45 = vstv %s1002_s15  ;;  %v419_v46 = vsel %vm416_vm12, %v418_v38, 0.0  ;;  %v420_v47 = vsel %vm417_vm13, %v418_v38, 0.0 }
  0x72   :  { %v349_v8 = vadd.f32 %v347_v61, %v341_v63  ;;  %v350_v9 = vadd.f32 %v348_v62, %v342_v2  ;;  %vm435_vm0 = vcmp.eq.s32.totalorder %v1017_v39, 48  ;;  %vm436_vm1 = vcmp.eq.s32.totalorder %v1022_v42, 48 }
  0x73   :  { %v437_v50 = vstv %s1007_s16  ;;  %v427_v51 = vsel %vm424_vm14, %v426_v45, 0.0  ;;  %v428_v24 = vsel %vm425_vm15, %v426_v45, 0.0  ;;  %vm443_vm2 = vcmp.eq.s32.totalorder %v1017_v39, 49 }
  0x74   :  { %v357_v13 = vadd.f32 %v355_v5, %v349_v8  ;;  %v358_v14 = vadd.f32 %v356_v7, %v350_v9  ;;  %vm444_vm3 = vcmp.eq.s32.totalorder %v1022_v42, 49  ;;  %v445_v21 = vstv %s1012_s17 }
  0x75   :  { %v438_v54 = vsel %vm435_vm0, %v437_v50, 0.0  ;;  %v439_v55 = vsel %vm436_vm1, %v437_v50, 0.0  ;;  %vm451_vm4 = vcmp.eq.s32.totalorder %v1017_v39, 50  ;;  %vm452_vm5 = vcmp.eq.s32.totalorder %v1022_v42, 50 }
  0x76   :  { %v365_v17 = vadd.f32 %v363_v11, %v357_v13  ;;  %v366_v0 = vadd.f32 %v364_v12, %v358_v14  ;;  %v453_v58 = vstv %s1019_s18  ;;  %v446_v59 = vsel %vm443_vm2, %v445_v21, 0.0 }
  0x77   :  { %v447_v60 = vsel %vm444_vm3, %v445_v21, 0.0  ;;  %vm459_vm6 = vcmp.eq.s32.totalorder %v1017_v39, 51  ;;  %vm460_vm7 = vcmp.eq.s32.totalorder %v1022_v42, 51  ;;  %v461_v63 = vstv %s1026_s19 }
  0x78   :  { %v373_v22 = vadd.f32 %v371_v1, %v365_v17  ;;  %v374_v23 = vadd.f32 %v372_v16, %v366_v0  ;;  %v454_v2 = vsel %vm451_vm4, %v453_v58, 0.0  ;;  %v455_v4 = vsel %vm452_vm5, %v453_v58, 0.0 }
  0x79   :  { %vm467_vm8 = vcmp.eq.s32.totalorder %v1017_v39, 52  ;;  %vm468_vm9 = vcmp.eq.s32.totalorder %v1022_v42, 52  ;;  %v469_v8 = vstv %s1033_s20  ;;  %v462_v9 = vsel %vm459_vm6, %v461_v63, 0.0 }
  0x7a   :  { %v381_v28 = vadd.f32 %v379_v19, %v373_v22  ;;  %v382_v29 = vadd.f32 %v380_v20, %v374_v23  ;;  %v463_v10 = vsel %vm460_vm7, %v461_v63, 0.0  ;;  %vm475_vm10 = vcmp.eq.s32.totalorder %v1017_v39, 53 }
  0x7b   :  { %vm476_vm11 = vcmp.eq.s32.totalorder %v1022_v42, 53  ;;  %v477_v13 = vstv %s1038_s21  ;;  %v470_v14 = vsel %vm467_vm8, %v469_v8, 0.0  ;;  %v471_v15 = vsel %vm468_vm9, %v469_v8, 0.0 }
  0x7c   :  { %v389_v33 = vadd.f32 %v387_v26, %v381_v28  ;;  %v390_v6 = vadd.f32 %v388_v27, %v382_v29  ;;  %vm483_vm12 = vcmp.eq.s32.totalorder %v1017_v39, 54  ;;  %vm484_vm13 = vcmp.eq.s32.totalorder %v1022_v42, 54 }
  0x7d   :  { %v485_v17 = vstv %s1043_s1  ;;  %v478_v0 = vsel %vm475_vm10, %v477_v13, 0.0  ;;  %v479_v18 = vsel %vm476_vm11, %v477_v13, 0.0  ;;  %vm491_vm14 = vcmp.eq.s32.totalorder %v1017_v39, 55 }
  0x7e   :  { %v397_v36 = vadd.f32 %v395_v31, %v389_v33  ;;  %v398_v37 = vadd.f32 %v396_v32, %v390_v6  ;;  %vm492_vm15 = vcmp.eq.s32.totalorder %v1022_v42, 55  ;;  %v493_v22 = vstv %s1048_s22 }
  0x7f   :  { %v486_v23 = vsel %vm483_vm12, %v485_v17, 0.0  ;;  %v487_v25 = vsel %vm484_vm13, %v485_v17, 0.0  ;;  %vm499_vm0 = vcmp.eq.s32.totalorder %v1017_v39, 56  ;;  %vm500_vm1 = vcmp.eq.s32.totalorder %v1022_v42, 56 }
  0x80   :  { %v405_v43 = vadd.f32 %v403_v35, %v397_v36  ;;  %v406_v44 = vadd.f32 %v404_v3, %v398_v37  ;;  %v501_v28 = vstv %s1053_s23  ;;  %v494_v29 = vsel %vm491_vm14, %v493_v22, 0.0 }
  0x81   :  { %v495_v30 = vsel %vm492_vm15, %v493_v22, 0.0  ;;  %vm507_vm2 = vcmp.eq.s32.totalorder %v1017_v39, 57  ;;  %vm508_vm3 = vcmp.eq.s32.totalorder %v1022_v42, 57  ;;  %v509_v33 = vstv %s1058_s24 }
  0x82   :  { %v413_v48 = vadd.f32 %v411_v40, %v405_v43  ;;  %v414_v49 = vadd.f32 %v412_v41, %v406_v44  ;;  %v502_v6 = vsel %vm499_vm0, %v501_v28, 0.0  ;;  %v503_v34 = vsel %vm500_vm1, %v501_v28, 0.0 }
  0x83   :  { %vm515_vm4 = vcmp.eq.s32.totalorder %v1017_v39, 58  ;;  %vm516_vm5 = vcmp.eq.s32.totalorder %v1022_v42, 58  ;;  %v517_v36 = vstv %s1063_s25  ;;  %v510_v37 = vsel %vm507_vm2, %v509_v33, 0.0 }
  0x84   :  { %v421_v52 = vadd.f32 %v419_v46, %v413_v48  ;;  %v422_v53 = vadd.f32 %v420_v47, %v414_v49  ;;  %v511_v38 = vsel %vm508_vm3, %v509_v33, 0.0  ;;  %vm523_vm6 = vcmp.eq.s32.totalorder %v1017_v39, 59 }
  0x85   :  { %vm524_vm7 = vcmp.eq.s32.totalorder %v1022_v42, 59  ;;  %v525_v43 = vstv %s1068_s26  ;;  %v518_v44 = vsel %vm515_vm4, %v517_v36, 0.0  ;;  %v519_v45 = vsel %vm516_vm5, %v517_v36, 0.0 }
  0x86   :  { %v429_v56 = vadd.f32 %v427_v51, %v421_v52  ;;  %v430_v57 = vadd.f32 %v428_v24, %v422_v53  ;;  %vm531_vm8 = vcmp.eq.s32.totalorder %v1017_v39, 60  ;;  %vm532_vm9 = vcmp.eq.s32.totalorder %v1022_v42, 60 }
  0x87   :  { %v533_v48 = vstv %s1073_s0  ;;  %v526_v49 = vsel %vm523_vm6, %v525_v43, 0.0  ;;  %v527_v50 = vsel %vm524_vm7, %v525_v43, 0.0  ;;  %vm539_vm10 = vcmp.eq.s32.totalorder %v1017_v39, 61 }
  0x88   :  { %v440_v61 = vadd.f32 %v438_v54, %v429_v56  ;;  %v441_v62 = vadd.f32 %v439_v55, %v430_v57  ;;  %vm540_vm11 = vcmp.eq.s32.totalorder %v1022_v42, 61  ;;  %v541_v52 = vstv %s1078_s27 }
  0x89   :  { %v534_v53 = vsel %vm531_vm8, %v533_v48, 0.0  ;;  %v535_v21 = vsel %vm532_vm9, %v533_v48, 0.0  ;;  %vm547_vm12 = vcmp.eq.s32.totalorder %v1017_v39, 62  ;;  %vm548_vm13 = vcmp.eq.s32.totalorder %v1022_v42, 62 }
  0x8a   :  { %v448_v5 = vadd.f32 %v446_v59, %v440_v61  ;;  %v449_v7 = vadd.f32 %v447_v60, %v441_v62  ;;  %v549_v56 = vstv %s1083_s28  ;;  %v542_v57 = vsel %vm539_vm10, %v541_v52, 0.0 }
  0x8b   :  { %v543_v58 = vsel %vm540_vm11, %v541_v52, 0.0  ;;  %vm555_vm14 = vcmp.eq.s32.totalorder %v1017_v39, 63  ;;  %vm556_vm15 = vcmp.eq.s32.totalorder %v1022_v42, 63  ;;  %v557_v61 = vstv %s1088_s29 }
  0x8c   :  { %v456_v11 = vadd.f32 %v454_v2, %v448_v5  ;;  %v457_v12 = vadd.f32 %v455_v4, %v449_v7  ;;  %v550_v62 = vsel %vm547_vm12, %v549_v56, 0.0  ;;  %v551_v63 = vsel %vm548_vm13, %v549_v56, 0.0 }
  0x8d   :  { %v558_v5 = vsel %vm555_vm14, %v557_v61, 0.0  ;;  %v559_v7 = vsel %vm556_vm15, %v557_v61, 0.0 }
  0x8e   :  { %v464_v1 = vadd.f32 %v462_v9, %v456_v11  ;;  %v465_v16 = vadd.f32 %v463_v10, %v457_v12 }
  0x90   :  { %v472_v19 = vadd.f32 %v470_v14, %v464_v1  ;;  %v473_v20 = vadd.f32 %v471_v15, %v465_v16 }
  0x92   :  { %v480_v26 = vadd.f32 %v478_v0, %v472_v19  ;;  %v481_v27 = vadd.f32 %v479_v18, %v473_v20 }
  0x94   :  { %v488_v31 = vadd.f32 %v486_v23, %v480_v26  ;;  %v489_v32 = vadd.f32 %v487_v25, %v481_v27 }
  0x96   :  { %v496_v35 = vadd.f32 %v494_v29, %v488_v31  ;;  %v497_v3 = vadd.f32 %v495_v30, %v489_v32 }
  0x98   :  { %v504_v40 = vadd.f32 %v502_v6, %v496_v35  ;;  %v505_v41 = vadd.f32 %v503_v34, %v497_v3 }
  0x9a   :  { %v512_v46 = vadd.f32 %v510_v37, %v504_v40  ;;  %v513_v47 = vadd.f32 %v511_v38, %v505_v41 }
  0x9c   :  { %v520_v51 = vadd.f32 %v518_v44, %v512_v46  ;;  %v521_v24 = vadd.f32 %v519_v45, %v513_v47 }
  0x9e   :  { %v528_v54 = vadd.f32 %v526_v49, %v520_v51  ;;  %v529_v55 = vadd.f32 %v527_v50, %v521_v24 }
  0xa0   :  { %v536_v59 = vadd.f32 %v534_v53, %v528_v54  ;;  %v537_v60 = vadd.f32 %v535_v21, %v529_v55 }
  0xa2   :  { %v544_v2 = vadd.f32 %v542_v57, %v536_v59  ;;  %v545_v4 = vadd.f32 %v543_v58, %v537_v60 }
  0xa4   :  { %v552_v8 = vadd.f32 %v550_v62, %v544_v2  ;;  %v553_v9 = vadd.f32 %v551_v63, %v545_v4 }
  0xa6   :  { %v560_v10 = vadd.f32 %v558_v5, %v552_v8  ;;  %v561_v11 = vadd.f32 %v559_v7, %v553_v9 }
  0xa8   :  { %562 = vst [vmem:[#allocation7] sm:$0xff] %v560_v10  ;;  %563 = vst [vmem:[#allocation7 + $0x8] sm:$0xff] %v561_v11 }
  0xa9   :  { %693 = shalt.err (!%p690_p3)
}
  0xaa   :  { %s694_s7 = scalar_lea.hbm %s1116_s2, 256 }
  0xab   :  { %p695_p4 = scmp.ne.s32.totalorder %s1116_s2, %s694_s7  ;;  %p698_p5 = scmp.lt.u32.totalorder %s694_s7, %s1116_s2 }
  0xad   :  { %p700_p6 = pnand %p698_p5, %p695_p4 }
  0xaf   :  { %703 = shalt.err (!%p700_p6)
}
  0xb0   :  { %573 = dma.vmem_to_hbm [thread:$0]  %s571_s3, 256, %s1116_s2, [#allocation4]  }
  0xb1   :  { %708 = dma.done.wait [#allocation4], 256  }
  0xb2   :  { %709 = vsyncadd [#allocation4], 4294967040 }
  0xb3   :  { %577 = vsyncpa [#allocation3], 1 }
  0xb4   :  { %578 = vsyncpa [#allocation4], 1 }
  0xb5   :  { %579 = vsyncpa [#allocation5], 1 }

</bundles_post_ra>
